<compile_context>
chip_gen: v7x
topology: tpu7x:2x2x1
jax: 0.10.0
libtpu: 0.0.40
codegen_flags: <defaults>
</compile_context>

<pallas_src>
import functools
import numpy as np
import jax
import jax.numpy as jnp
from jax.experimental import pallas as pl
from jax.experimental.pallas import tpu as pltpu

# ---------------- config (small, consistent with the module) ----------------
D_MODEL = 32
N_HEADS = 4
HEAD_DIM = D_MODEL // N_HEADS
HIDDEN = 64
SEQ_THRESHOLD = 100.0                                        # stand-in for threshold_wordcount
SCALEUP = float(np.log2(SEQ_THRESHOLD ** 2 - SEQ_THRESHOLD))  # ScaleUp init (scaling_factor)
LN_EPS = 1e-5                                                # nn.LayerNorm default
L2_EPS = 1e-12                                               # F.normalize default
NEG_INF = -1e18                                              # masked_fill value
B = 2
DEST_LEN = 8
SRC_LEN = 8


# ---------------------------------------------------------------------------
# Pallas kernel
# ---------------------------------------------------------------------------
def _layer_norm(y, g, b):
    mu = jnp.mean(y, axis=-1, keepdims=True)
    var = jnp.mean((y - mu) ** 2, axis=-1, keepdims=True)
    return (y - mu) * jax.lax.rsqrt(var + LN_EPS) * g + b


def _l2_normalize(x):
    # F.normalize(x, p=2, dim=-1): x / max(||x||_2, eps)
    nrm = jnp.sqrt(jnp.sum(x * x, axis=-1, keepdims=True))
    return x * pl.reciprocal(jnp.maximum(nrm, L2_EPS), approx=True)


def _decoder_block_kernel(dest_ref, src_ref, dmask_ref, smask_ref,
                          wqkv_ref, bqkv_ref, wo_ref, bo_ref,
                          lng_ref, lnb_ref,
                          w1_ref, b1_ref, w2_ref, b2_ref,
                          out_ref, attn_ref,
                          *, n_heads, scaleup):
    # One batch element per grid step (grid axis is "parallel" -> both TCs on v7x).
    x = dest_ref[0]          # [Tq, D]  dest_inputs
    src = src_ref[0]         # [Tk, D]  src_encoded
    dmask = dmask_ref[0]     # [1, Tq]  key-padding mask for self-attention
    smask = smask_ref[0]     # [1, Tk]  key-padding mask for cross-attention

    def mha(q_in, kv_in, key_mask, layer):
        # Weights are pre-shaped head-major in the wrapper:
        #   wqkv_ref: [2, 3, H, D, hd]   bqkv_ref: [2, 3, H, 1, hd]
        #   wo_ref:   [2, H, hd, D]      bo_ref:   [2, 1, D]
        h = n_heads
        tq, d = q_in.shape
        tk = kv_in.shape[0]
        qb = jnp.broadcast_to(q_in[None], (h, tq, d))
        kb = jnp.broadcast_to(kv_in[None], (h, tk, d))
        # Head-batched projections (one batched dot_general each, no per-head loop).
        q = jnp.einsum('htd,hde->hte', qb, wqkv_ref[layer, 0],
                       preferred_element_type=jnp.float32) + bqkv_ref[layer, 0]
        k = jnp.einsum('htd,hde->hte', kb, wqkv_ref[layer, 1],
                       preferred_element_type=jnp.float32) + bqkv_ref[layer, 1]
        v = jnp.einsum('htd,hde->hte', kb, wqkv_ref[layer, 2],
                       preferred_element_type=jnp.float32) + bqkv_ref[layer, 2]
        q = _l2_normalize(q)
        k = _l2_normalize(k)
        # ScaleUp (learned scalar; passed at its initial value as a constant).
        s = scaleup * jnp.einsum('hqe,hke->hqk', q, k,
                                 preferred_element_type=jnp.float32)
        s = jnp.where((key_mask == 0)[None], NEG_INF, s)      # [H, Tq, Tk]
        s = s - jnp.max(s, axis=-1, keepdims=True)
        p = jnp.exp(s)
        p = p * pl.reciprocal(jnp.sum(p, axis=-1, keepdims=True), approx=True)
        ctx = jnp.einsum('hqk,hke->hqe', p, v,
                         preferred_element_type=jnp.float32)  # [H, Tq, hd]
        # fc_o folded per-head and reduced over heads (replaces concat + matmul).
        ctx = jnp.einsum('hqe,hej->hqj', ctx, wo_ref[layer],
                         preferred_element_type=jnp.float32)  # [H, Tq, D]
        ctx = jnp.sum(ctx, axis=0) + bo_ref[layer]            # [Tq, D]
        return ctx, p

    lng = lng_ref[...]       # [3, D] LayerNorm gammas (rows: self / cross / ffn)
    lnb = lnb_ref[...]       # [3, D] LayerNorm betas

    # 1) masked self-attention + residual + LayerNorm   (dropout = identity)
    mctx, _ = mha(x, x, dmask, 0)
    h1 = _layer_norm(mctx + x, lng[0:1], lnb[0:1])

    # 2) cross-attention + residual + LayerNorm
    cctx, attn_w = mha(h1, src, smask, 1)
    h2 = _layer_norm(cctx + h1, lng[1:2], lnb[1:2])

    # 3) position-wise feed-forward + residual + LayerNorm
    ff = jnp.maximum(
        jnp.dot(h2, w1_ref[...], preferred_element_type=jnp.float32) + b1_ref[...],
        0.0)
    ff = jnp.dot(ff, w2_ref[...], preferred_element_type=jnp.float32) + b2_ref[...]
    out_ref[0] = _layer_norm(ff + h2, lng[2:3], lnb[2:3])
    attn_ref[0] = attn_w


# ---------------------------------------------------------------------------
# Wrapper
# ---------------------------------------------------------------------------
def decoder_block_forward(params, dest_inputs, src_encoded, dest_mask, src_mask):
    bsz, tq, d = dest_inputs.shape
    tk = src_encoded.shape[1]
    dmask3 = dest_mask.reshape(bsz, 1, tq).astype(jnp.int32)
    smask3 = src_mask.reshape(bsz, 1, tk).astype(jnp.int32)

    kern = functools.partial(_decoder_block_kernel,
                             n_heads=N_HEADS, scaleup=SCALEUP)

    p_arrays = [params['wqkv'], params['bqkv'], params['wo'], params['bo'],
                params['ln_g'], params['ln_b'],
                params['ffn_w1'], params['ffn_b1'],
                params['ffn_w2'], params['ffn_b2']]

    def const_spec(a):
        nd = a.ndim
        return pl.BlockSpec(a.shape, lambda b, _nd=nd: (0,) * _nd)

    in_specs = ([pl.BlockSpec((1, tq, d), lambda b: (b, 0, 0)),
                 pl.BlockSpec((1, tk, d), lambda b: (b, 0, 0)),
                 pl.BlockSpec((1, 1, tq), lambda b: (b, 0, 0)),
                 pl.BlockSpec((1, 1, tk), lambda b: (b, 0, 0))]
                + [const_spec(a) for a in p_arrays])

    out_specs = (pl.BlockSpec((1, tq, d), lambda b: (b, 0, 0)),
                 pl.BlockSpec((1, N_HEADS, tq, tk), lambda b: (b, 0, 0, 0)))
    out_shape = (jax.ShapeDtypeStruct((bsz, tq, d), jnp.float32),
                 jax.ShapeDtypeStruct((bsz, N_HEADS, tq, tk), jnp.float32))

    return pl.pallas_call(
        kern,
        grid=(bsz,),
        in_specs=in_specs,
        out_specs=out_specs,
        out_shape=out_shape,
        compiler_params=pltpu.CompilerParams(dimension_semantics=("parallel",)),
    )(dest_inputs, src_encoded, dmask3, smask3, *p_arrays)


# ---------------------------------------------------------------------------
# Parameter setup (packed, head-major slabs prepared wrapper-side for free)
# ---------------------------------------------------------------------------
def init_params(key):
    def dense(k, din, dout, scale=0.05):
        kw, kb = jax.random.split(k)
        return (jax.random.normal(kw, (din, dout), jnp.float32) * scale,
                jax.random.normal(kb, (dout,), jnp.float32) * scale)

    h, hd, d = N_HEADS, HEAD_DIM, D_MODEL
    keys = jax.random.split(key, 4)

    def attn_pack(k4):
        ks = jax.random.split(k4, 4)
        wq, bq = dense(ks[0], d, d)
        wk, bk = dense(ks[1], d, d)
        wv, bv = dense(ks[2], d, d)
        wo, bo = dense(ks[3], d, d)
        # head-major: Wq_h[h, din, e] = Wq[din, h*hd + e]
        wqkv = jnp.stack([w.reshape(d, h, hd).transpose(1, 0, 2)
                          for w in (wq, wk, wv)], axis=0)            # [3, H, D, hd]
        bqkv = jnp.stack([bb.reshape(h, 1, hd)
                          for bb in (bq, bk, bv)], axis=0)           # [3, H, 1, hd]
        wo_h = wo.reshape(h, hd, d)                                  # [H, hd, D]
        return wqkv, bqkv, wo_h, bo.reshape(1, d)

    self_w = attn_pack(keys[0])
    cross_w = attn_pack(keys[1])
    w1, b1 = dense(keys[2], d, HIDDEN)
    w2, b2 = dense(keys[3], HIDDEN, d)

    return {
        'wqkv': jnp.stack([self_w[0], cross_w[0]], axis=0),   # [2, 3, H, D, hd]
        'bqkv': jnp.stack([self_w[1], cross_w[1]], axis=0),   # [2, 3, H, 1, hd]
        'wo':   jnp.stack([self_w[2], cross_w[2]], axis=0),   # [2, H, hd, D]
        'bo':   jnp.stack([self_w[3], cross_w[3]], axis=0),   # [2, 1, D]
        'ln_g': jnp.ones((3, d), jnp.float32),
        'ln_b': jnp.zeros((3, d), jnp.float32),
        'ffn_w1': w1, 'ffn_b1': b1.reshape(1, HIDDEN),
        'ffn_w2': w2, 'ffn_b2': b2.reshape(1, d),
    }


if __name__ == "__main__":
    key = jax.random.PRNGKey(0)
    k_par, k_dest, k_src = jax.random.split(key, 3)
    params = init_params(k_par)

    dest_inputs = jax.random.normal(k_dest, (B, DEST_LEN, D_MODEL), jnp.float32)
    src_encoded = jax.random.normal(k_src, (B, SRC_LEN, D_MODEL), jnp.float32)
    # key-padding masks (0 = padded position)
    dest_mask = jnp.ones((B, DEST_LEN), jnp.int32).at[1, -1:].set(0)
    src_mask = jnp.ones((B, SRC_LEN), jnp.int32).at[1, -2:].set(0)

    fwd = jax.jit(functools.partial(decoder_block_forward, params))
    outputs, attn_w = fwd(dest_inputs, src_encoded, dest_mask, src_mask)
    outputs, attn_w = jax.block_until_ready((outputs, attn_w))

    assert outputs.shape == (B, DEST_LEN, D_MODEL)
    assert attn_w.shape == (B, N_HEADS, DEST_LEN, SRC_LEN)
    assert bool(jnp.all(jnp.isfinite(outputs))) and bool(jnp.all(jnp.isfinite(attn_w)))
    print("KERNEL_OK")
</pallas_src>

<mosaic_0001>
module attributes {stable_mosaic.version = 11 : i64} {
  func.func @_decoder_block_kernel(%arg0: i32, %arg1: memref<1x8x32xf32, #tpu.memory_space<vmem>>, %arg2: memref<1x8x32xf32, #tpu.memory_space<vmem>>, %arg3: memref<1x1x8xi32, #tpu.memory_space<vmem>>, %arg4: memref<1x1x8xi32, #tpu.memory_space<vmem>>, %arg5: memref<2x3x4x32x8xf32, #tpu.memory_space<vmem>>, %arg6: memref<2x3x4x1x8xf32, #tpu.memory_space<vmem>>, %arg7: memref<2x4x8x32xf32, #tpu.memory_space<vmem>>, %arg8: memref<2x1x32xf32, #tpu.memory_space<vmem>>, %arg9: memref<3x32xf32, #tpu.memory_space<vmem>>, %arg10: memref<3x32xf32, #tpu.memory_space<vmem>>, %arg11: memref<32x64xf32, #tpu.memory_space<vmem>>, %arg12: memref<1x64xf32, #tpu.memory_space<vmem>>, %arg13: memref<64x32xf32, #tpu.memory_space<vmem>>, %arg14: memref<1x32xf32, #tpu.memory_space<vmem>>, %arg15: memref<1x8x32xf32, #tpu.memory_space<vmem>>, %arg16: memref<1x4x8x8xf32, #tpu.memory_space<vmem>>) attributes {dimension_semantics = [#tpu.dimension_semantics<parallel>], iteration_bounds = array<i64: 2>, scalar_prefetch = 0 : i64, scratch_operands = 0 : i64, tpu.core_type = #tpu.core_type<tc>, window_params = [{transform_indices = @transform_0, window_bounds = array<i64: 1, 8, 32>}, {transform_indices = @transform_1, window_bounds = array<i64: 1, 8, 32>}, {transform_indices = @transform_2, window_bounds = array<i64: 1, 1, 8>}, {transform_indices = @transform_3, window_bounds = array<i64: 1, 1, 8>}, {pipeline_mode = #tpu.pipeline_mode<synchronous>, transform_indices = @transform_4, window_bounds = array<i64: 2, 3, 4, 32, 8>}, {pipeline_mode = #tpu.pipeline_mode<synchronous>, transform_indices = @transform_5, window_bounds = array<i64: 2, 3, 4, 1, 8>}, {pipeline_mode = #tpu.pipeline_mode<synchronous>, transform_indices = @transform_6, window_bounds = array<i64: 2, 4, 8, 32>}, {pipeline_mode = #tpu.pipeline_mode<synchronous>, transform_indices = @transform_7, window_bounds = array<i64: 2, 1, 32>}, {pipeline_mode = #tpu.pipeline_mode<synchronous>, transform_indices = @transform_8, window_bounds = array<i64: 3, 32>}, {pipeline_mode = #tpu.pipeline_mode<synchronous>, transform_indices = @transform_9, window_bounds = array<i64: 3, 32>}, {pipeline_mode = #tpu.pipeline_mode<synchronous>, transform_indices = @transform_10, window_bounds = array<i64: 32, 64>}, {pipeline_mode = #tpu.pipeline_mode<synchronous>, transform_indices = @transform_11, window_bounds = array<i64: 1, 64>}, {pipeline_mode = #tpu.pipeline_mode<synchronous>, transform_indices = @transform_12, window_bounds = array<i64: 64, 32>}, {pipeline_mode = #tpu.pipeline_mode<synchronous>, transform_indices = @transform_13, window_bounds = array<i64: 1, 32>}, {transform_indices = @transform_14, window_bounds = array<i64: 1, 8, 32>}, {transform_indices = @transform_15, window_bounds = array<i64: 1, 4, 8, 8>}]} {
    %c0 = arith.constant 0 : index
    %c0_0 = arith.constant 0 : index
    %c0_1 = arith.constant 0 : index
    %0 = vector.load %arg1[%c0, %c0_0, %c0_1] : memref<1x8x32xf32, #tpu.memory_space<vmem>>, vector<1x8x32xf32>
    %1 = vector.shape_cast %0 : vector<1x8x32xf32> to vector<8x32xf32>
    %c0_2 = arith.constant 0 : index
    %c0_3 = arith.constant 0 : index
    %c0_4 = arith.constant 0 : index
    %2 = vector.load %arg2[%c0_2, %c0_3, %c0_4] : memref<1x8x32xf32, #tpu.memory_space<vmem>>, vector<1x8x32xf32>
    %3 = vector.shape_cast %2 : vector<1x8x32xf32> to vector<8x32xf32>
    %c0_5 = arith.constant 0 : index
    %c0_6 = arith.constant 0 : index
    %c0_7 = arith.constant 0 : index
    %4 = vector.load %arg3[%c0_5, %c0_6, %c0_7] : memref<1x1x8xi32, #tpu.memory_space<vmem>>, vector<1x1x8xi32>
    %5 = vector.shape_cast %4 : vector<1x1x8xi32> to vector<1x8xi32>
    %c0_8 = arith.constant 0 : index
    %c0_9 = arith.constant 0 : index
    %c0_10 = arith.constant 0 : index
    %6 = vector.load %arg4[%c0_8, %c0_9, %c0_10] : memref<1x1x8xi32, #tpu.memory_space<vmem>>, vector<1x1x8xi32>
    %7 = vector.shape_cast %6 : vector<1x1x8xi32> to vector<1x8xi32>
    %c0_11 = arith.constant 0 : index
    %c0_12 = arith.constant 0 : index
    %8 = vector.load %arg9[%c0_11, %c0_12] : memref<3x32xf32, #tpu.memory_space<vmem>>, vector<3x32xf32>
    %c0_13 = arith.constant 0 : index
    %c0_14 = arith.constant 0 : index
    %9 = vector.load %arg10[%c0_13, %c0_14] : memref<3x32xf32, #tpu.memory_space<vmem>>, vector<3x32xf32>
    %10 = vector.shape_cast %1 : vector<8x32xf32> to vector<1x8x32xf32>
    %11 = vector.shape_cast %10 : vector<1x8x32xf32> to vector<1x8x32xf32>
    %12 = vector.broadcast %11 : vector<1x8x32xf32> to vector<4x8x32xf32>
    %13 = vector.shape_cast %1 : vector<8x32xf32> to vector<1x8x32xf32>
    %14 = vector.shape_cast %13 : vector<1x8x32xf32> to vector<1x8x32xf32>
    %15 = vector.broadcast %14 : vector<1x8x32xf32> to vector<4x8x32xf32>
    %c0_15 = arith.constant 0 : index
    %c0_16 = arith.constant 0 : index
    %c0_17 = arith.constant 0 : index
    %c0_18 = arith.constant 0 : index
    %c0_19 = arith.constant 0 : index
    %16 = vector.load %arg5[%c0_15, %c0_16, %c0_17, %c0_18, %c0_19] : memref<2x3x4x32x8xf32, #tpu.memory_space<vmem>>, vector<1x1x4x32x8xf32>
    %17 = vector.shape_cast %16 : vector<1x1x4x32x8xf32> to vector<4x32x8xf32>
    "tpu.trace_start"() <{level = 10 : i32, message = "htd,hde->hte"}> : () -> ()
    %cst = arith.constant dense<0.000000e+00> : vector<4x8x8xf32>
    %18 = tpu.matmul %12, %17, %cst {dimension_numbers = #tpu.dot_dimension_numbers<[2], [1], [1], [2], [0, 0, 0, 1, 1, 2], [0], [0]>} : vector<4x8x32xf32>, vector<4x32x8xf32>, vector<4x8x8xf32> -> vector<4x8x8xf32>
    "tpu.trace_stop"() : () -> ()
    %c0_20 = arith.constant 0 : index
    %c0_21 = arith.constant 0 : index
    %c0_22 = arith.constant 0 : index
    %c0_23 = arith.constant 0 : index
    %c0_24 = arith.constant 0 : index
    %19 = vector.load %arg6[%c0_20, %c0_21, %c0_22, %c0_23, %c0_24] : memref<2x3x4x1x8xf32, #tpu.memory_space<vmem>>, vector<1x1x4x1x8xf32>
    %20 = vector.shape_cast %19 : vector<1x1x4x1x8xf32> to vector<4x1x8xf32>
    %21 = vector.broadcast %20 : vector<4x1x8xf32> to vector<4x8x8xf32>
    %22 = arith.addf %18, %21 : vector<4x8x8xf32>
    %c0_25 = arith.constant 0 : index
    %c1 = arith.constant 1 : index
    %c0_26 = arith.constant 0 : index
    %c0_27 = arith.constant 0 : index
    %c0_28 = arith.constant 0 : index
    %23 = vector.load %arg5[%c0_25, %c1, %c0_26, %c0_27, %c0_28] : memref<2x3x4x32x8xf32, #tpu.memory_space<vmem>>, vector<1x1x4x32x8xf32>
    %24 = vector.shape_cast %23 : vector<1x1x4x32x8xf32> to vector<4x32x8xf32>
    "tpu.trace_start"() <{level = 10 : i32, message = "htd,hde->hte"}> : () -> ()
    %cst_29 = arith.constant dense<0.000000e+00> : vector<4x8x8xf32>
    %25 = tpu.matmul %15, %24, %cst_29 {dimension_numbers = #tpu.dot_dimension_numbers<[2], [1], [1], [2], [0, 0, 0, 1, 1, 2], [0], [0]>} : vector<4x8x32xf32>, vector<4x32x8xf32>, vector<4x8x8xf32> -> vector<4x8x8xf32>
    "tpu.trace_stop"() : () -> ()
    %c0_30 = arith.constant 0 : index
    %c1_31 = arith.constant 1 : index
    %c0_32 = arith.constant 0 : index
    %c0_33 = arith.constant 0 : index
    %c0_34 = arith.constant 0 : index
    %26 = vector.load %arg6[%c0_30, %c1_31, %c0_32, %c0_33, %c0_34] : memref<2x3x4x1x8xf32, #tpu.memory_space<vmem>>, vector<1x1x4x1x8xf32>
    %27 = vector.shape_cast %26 : vector<1x1x4x1x8xf32> to vector<4x1x8xf32>
    %28 = vector.broadcast %27 : vector<4x1x8xf32> to vector<4x8x8xf32>
    %29 = arith.addf %25, %28 : vector<4x8x8xf32>
    %c0_35 = arith.constant 0 : index
    %c2 = arith.constant 2 : index
    %c0_36 = arith.constant 0 : index
    %c0_37 = arith.constant 0 : index
    %c0_38 = arith.constant 0 : index
    %30 = vector.load %arg5[%c0_35, %c2, %c0_36, %c0_37, %c0_38] : memref<2x3x4x32x8xf32, #tpu.memory_space<vmem>>, vector<1x1x4x32x8xf32>
    %31 = vector.shape_cast %30 : vector<1x1x4x32x8xf32> to vector<4x32x8xf32>
    "tpu.trace_start"() <{level = 10 : i32, message = "htd,hde->hte"}> : () -> ()
    %cst_39 = arith.constant dense<0.000000e+00> : vector<4x8x8xf32>
    %32 = tpu.matmul %15, %31, %cst_39 {dimension_numbers = #tpu.dot_dimension_numbers<[2], [1], [1], [2], [0, 0, 0, 1, 1, 2], [0], [0]>} : vector<4x8x32xf32>, vector<4x32x8xf32>, vector<4x8x8xf32> -> vector<4x8x8xf32>
    "tpu.trace_stop"() : () -> ()
    %c0_40 = arith.constant 0 : index
    %c2_41 = arith.constant 2 : index
    %c0_42 = arith.constant 0 : index
    %c0_43 = arith.constant 0 : index
    %c0_44 = arith.constant 0 : index
    %33 = vector.load %arg6[%c0_40, %c2_41, %c0_42, %c0_43, %c0_44] : memref<2x3x4x1x8xf32, #tpu.memory_space<vmem>>, vector<1x1x4x1x8xf32>
    %34 = vector.shape_cast %33 : vector<1x1x4x1x8xf32> to vector<4x1x8xf32>
    %35 = vector.broadcast %34 : vector<4x1x8xf32> to vector<4x8x8xf32>
    %36 = arith.addf %32, %35 : vector<4x8x8xf32>
    %37 = arith.mulf %22, %22 : vector<4x8x8xf32>
    %cst_45 = arith.constant dense<0.000000e+00> : vector<4x8xf32>
    %38 = vector.multi_reduction <add>, %37, %cst_45 [2] : vector<4x8x8xf32> to vector<4x8xf32>
    %39 = vector.shape_cast %38 : vector<4x8xf32> to vector<4x8x1xf32>
    %40 = math.sqrt %39 : vector<4x8x1xf32>
    %cst_46 = arith.constant 9.99999996E-13 : f32
    %41 = vector.broadcast %cst_46 : f32 to vector<4x8x1xf32>
    %42 = arith.maximumf %40, %41 : vector<4x8x1xf32>
    %43 = tpu.reciprocal %42 {approx = true} : vector<4x8x1xf32> -> vector<4x8x1xf32>
    %44 = vector.broadcast %43 : vector<4x8x1xf32> to vector<4x8x8xf32>
    %45 = arith.mulf %22, %44 : vector<4x8x8xf32>
    %46 = arith.mulf %29, %29 : vector<4x8x8xf32>
    %cst_47 = arith.constant dense<0.000000e+00> : vector<4x8xf32>
    %47 = vector.multi_reduction <add>, %46, %cst_47 [2] : vector<4x8x8xf32> to vector<4x8xf32>
    %48 = vector.shape_cast %47 : vector<4x8xf32> to vector<4x8x1xf32>
    %49 = math.sqrt %48 : vector<4x8x1xf32>
    %cst_48 = arith.constant 9.99999996E-13 : f32
    %50 = vector.broadcast %cst_48 : f32 to vector<4x8x1xf32>
    %51 = arith.maximumf %49, %50 : vector<4x8x1xf32>
    %52 = tpu.reciprocal %51 {approx = true} : vector<4x8x1xf32> -> vector<4x8x1xf32>
    %53 = vector.broadcast %52 : vector<4x8x1xf32> to vector<4x8x8xf32>
    %54 = arith.mulf %29, %53 : vector<4x8x8xf32>
    "tpu.trace_start"() <{level = 10 : i32, message = "hqe,hke->hqk"}> : () -> ()
    %cst_49 = arith.constant dense<0.000000e+00> : vector<4x8x8xf32>
    %55 = tpu.matmul %45, %54, %cst_49 {dimension_numbers = #tpu.dot_dimension_numbers<[2], [2], [1], [1], [0, 0, 0, 1, 1, 1], [0], [0]>} : vector<4x8x8xf32>, vector<4x8x8xf32>, vector<4x8x8xf32> -> vector<4x8x8xf32>
    "tpu.trace_stop"() : () -> ()
    %cst_50 = arith.constant 13.2732124 : f32
    %56 = vector.broadcast %cst_50 : f32 to vector<4x8x8xf32>
    %57 = arith.mulf %56, %55 : vector<4x8x8xf32>
    %c0_i32 = arith.constant 0 : i32
    %58 = vector.broadcast %c0_i32 : i32 to vector<1x8xi32>
    %59 = arith.cmpi eq, %5, %58 : vector<1x8xi32>
    %60 = vector.shape_cast %59 : vector<1x8xi1> to vector<1x1x8xi1>
    %cst_51 = arith.constant -9.99999984E+17 : f32
    %61 = vector.shape_cast %60 : vector<1x1x8xi1> to vector<1x1x8xi1>
    %62 = vector.broadcast %61 : vector<1x1x8xi1> to vector<4x8x8xi1>
    %63 = vector.broadcast %cst_51 : f32 to vector<4x8x8xf32>
    %64 = arith.select %62, %63, %57 : vector<4x8x8xi1>, vector<4x8x8xf32>
    %cst_52 = arith.constant dense<0xFF800000> : vector<4x8xf32>
    %65 = vector.multi_reduction <maximumf>, %64, %cst_52 [2] : vector<4x8x8xf32> to vector<4x8xf32>
    %66 = vector.shape_cast %65 : vector<4x8xf32> to vector<4x8x1xf32>
    %67 = vector.broadcast %66 : vector<4x8x1xf32> to vector<4x8x8xf32>
    %68 = arith.subf %64, %67 : vector<4x8x8xf32>
    %69 = math.exp %68 : vector<4x8x8xf32>
    %cst_53 = arith.constant dense<0.000000e+00> : vector<4x8xf32>
    %70 = vector.multi_reduction <add>, %69, %cst_53 [2] : vector<4x8x8xf32> to vector<4x8xf32>
    %71 = vector.shape_cast %70 : vector<4x8xf32> to vector<4x8x1xf32>
    %72 = tpu.reciprocal %71 {approx = true} : vector<4x8x1xf32> -> vector<4x8x1xf32>
    %73 = vector.broadcast %72 : vector<4x8x1xf32> to vector<4x8x8xf32>
    %74 = arith.mulf %69, %73 : vector<4x8x8xf32>
    "tpu.trace_start"() <{level = 10 : i32, message = "hqk,hke->hqe"}> : () -> ()
    %cst_54 = arith.constant dense<0.000000e+00> : vector<4x8x8xf32>
    %75 = tpu.matmul %74, %36, %cst_54 {dimension_numbers = #tpu.dot_dimension_numbers<[2], [1], [1], [2], [0, 0, 0, 1, 1, 2], [0], [0]>} : vector<4x8x8xf32>, vector<4x8x8xf32>, vector<4x8x8xf32> -> vector<4x8x8xf32>
    "tpu.trace_stop"() : () -> ()
    %c0_55 = arith.constant 0 : index
    %c0_56 = arith.constant 0 : index
    %c0_57 = arith.constant 0 : index
    %c0_58 = arith.constant 0 : index
    %76 = vector.load %arg7[%c0_55, %c0_56, %c0_57, %c0_58] : memref<2x4x8x32xf32, #tpu.memory_space<vmem>>, vector<1x4x8x32xf32>
    %77 = vector.shape_cast %76 : vector<1x4x8x32xf32> to vector<4x8x32xf32>
    "tpu.trace_start"() <{level = 10 : i32, message = "hqe,hej->hqj"}> : () -> ()
    %cst_59 = arith.constant dense<0.000000e+00> : vector<4x8x32xf32>
    %78 = tpu.matmul %75, %77, %cst_59 {dimension_numbers = #tpu.dot_dimension_numbers<[2], [1], [1], [2], [0, 0, 0, 1, 1, 2], [0], [0]>} : vector<4x8x8xf32>, vector<4x8x32xf32>, vector<4x8x32xf32> -> vector<4x8x32xf32>
    "tpu.trace_stop"() : () -> ()
    %cst_60 = arith.constant dense<0.000000e+00> : vector<8x32xf32>
    %79 = vector.multi_reduction <add>, %78, %cst_60 [0] : vector<4x8x32xf32> to vector<8x32xf32>
    %c0_61 = arith.constant 0 : index
    %c0_62 = arith.constant 0 : index
    %c0_63 = arith.constant 0 : index
    %80 = vector.load %arg8[%c0_61, %c0_62, %c0_63] : memref<2x1x32xf32, #tpu.memory_space<vmem>>, vector<1x1x32xf32>
    %81 = vector.shape_cast %80 : vector<1x1x32xf32> to vector<1x32xf32>
    %82 = vector.broadcast %81 : vector<1x32xf32> to vector<8x32xf32>
    %83 = arith.addf %79, %82 : vector<8x32xf32>
    %84 = arith.addf %83, %1 : vector<8x32xf32>
    %85 = vector.extract_strided_slice %8 {offsets = [0, 0], sizes = [1, 32], strides = [1, 1]} : vector<3x32xf32> to vector<1x32xf32>
    %86 = vector.extract_strided_slice %9 {offsets = [0, 0], sizes = [1, 32], strides = [1, 1]} : vector<3x32xf32> to vector<1x32xf32>
    %cst_64 = arith.constant dense<0.000000e+00> : vector<8xf32>
    %87 = vector.multi_reduction <add>, %84, %cst_64 [1] : vector<8x32xf32> to vector<8xf32>
    %88 = vector.shape_cast %87 : vector<8xf32> to vector<8x1xf32>
    %cst_65 = arith.constant 3.200000e+01 : f32
    %89 = vector.broadcast %cst_65 : f32 to vector<8x1xf32>
    %90 = arith.divf %88, %89 : vector<8x1xf32>
    %91 = vector.broadcast %90 : vector<8x1xf32> to vector<8x32xf32>
    %92 = arith.subf %84, %91 : vector<8x32xf32>
    %93 = arith.mulf %92, %92 : vector<8x32xf32>
    %cst_66 = arith.constant dense<0.000000e+00> : vector<8xf32>
    %94 = vector.multi_reduction <add>, %93, %cst_66 [1] : vector<8x32xf32> to vector<8xf32>
    %95 = vector.shape_cast %94 : vector<8xf32> to vector<8x1xf32>
    %cst_67 = arith.constant 3.200000e+01 : f32
    %96 = vector.broadcast %cst_67 : f32 to vector<8x1xf32>
    %97 = arith.divf %95, %96 : vector<8x1xf32>
    %98 = vector.broadcast %90 : vector<8x1xf32> to vector<8x32xf32>
    %99 = arith.subf %84, %98 : vector<8x32xf32>
    %cst_68 = arith.constant 9.99999974E-6 : f32
    %100 = vector.broadcast %cst_68 : f32 to vector<8x1xf32>
    %101 = arith.addf %97, %100 : vector<8x1xf32>
    %102 = math.rsqrt %101 : vector<8x1xf32>
    %103 = vector.broadcast %102 : vector<8x1xf32> to vector<8x32xf32>
    %104 = arith.mulf %99, %103 : vector<8x32xf32>
    %105 = vector.broadcast %85 : vector<1x32xf32> to vector<8x32xf32>
    %106 = arith.mulf %104, %105 : vector<8x32xf32>
    %107 = vector.broadcast %86 : vector<1x32xf32> to vector<8x32xf32>
    %108 = arith.addf %106, %107 : vector<8x32xf32>
    %109 = vector.shape_cast %108 : vector<8x32xf32> to vector<1x8x32xf32>
    %110 = vector.shape_cast %109 : vector<1x8x32xf32> to vector<1x8x32xf32>
    %111 = vector.broadcast %110 : vector<1x8x32xf32> to vector<4x8x32xf32>
    %112 = vector.shape_cast %3 : vector<8x32xf32> to vector<1x8x32xf32>
    %113 = vector.shape_cast %112 : vector<1x8x32xf32> to vector<1x8x32xf32>
    %114 = vector.broadcast %113 : vector<1x8x32xf32> to vector<4x8x32xf32>
    %c1_69 = arith.constant 1 : index
    %c0_70 = arith.constant 0 : index
    %c0_71 = arith.constant 0 : index
    %c0_72 = arith.constant 0 : index
    %c0_73 = arith.constant 0 : index
    %115 = vector.load %arg5[%c1_69, %c0_70, %c0_71, %c0_72, %c0_73] : memref<2x3x4x32x8xf32, #tpu.memory_space<vmem>>, vector<1x1x4x32x8xf32>
    %116 = vector.shape_cast %115 : vector<1x1x4x32x8xf32> to vector<4x32x8xf32>
    "tpu.trace_start"() <{level = 10 : i32, message = "htd,hde->hte"}> : () -> ()
    %cst_74 = arith.constant dense<0.000000e+00> : vector<4x8x8xf32>
    %117 = tpu.matmul %111, %116, %cst_74 {dimension_numbers = #tpu.dot_dimension_numbers<[2], [1], [1], [2], [0, 0, 0, 1, 1, 2], [0], [0]>} : vector<4x8x32xf32>, vector<4x32x8xf32>, vector<4x8x8xf32> -> vector<4x8x8xf32>
    "tpu.trace_stop"() : () -> ()
    %c1_75 = arith.constant 1 : index
    %c0_76 = arith.constant 0 : index
    %c0_77 = arith.constant 0 : index
    %c0_78 = arith.constant 0 : index
    %c0_79 = arith.constant 0 : index
    %118 = vector.load %arg6[%c1_75, %c0_76, %c0_77, %c0_78, %c0_79] : memref<2x3x4x1x8xf32, #tpu.memory_space<vmem>>, vector<1x1x4x1x8xf32>
    %119 = vector.shape_cast %118 : vector<1x1x4x1x8xf32> to vector<4x1x8xf32>
    %120 = vector.broadcast %119 : vector<4x1x8xf32> to vector<4x8x8xf32>
    %121 = arith.addf %117, %120 : vector<4x8x8xf32>
    %c1_80 = arith.constant 1 : index
    %c1_81 = arith.constant 1 : index
    %c0_82 = arith.constant 0 : index
    %c0_83 = arith.constant 0 : index
    %c0_84 = arith.constant 0 : index
    %122 = vector.load %arg5[%c1_80, %c1_81, %c0_82, %c0_83, %c0_84] : memref<2x3x4x32x8xf32, #tpu.memory_space<vmem>>, vector<1x1x4x32x8xf32>
    %123 = vector.shape_cast %122 : vector<1x1x4x32x8xf32> to vector<4x32x8xf32>
    "tpu.trace_start"() <{level = 10 : i32, message = "htd,hde->hte"}> : () -> ()
    %cst_85 = arith.constant dense<0.000000e+00> : vector<4x8x8xf32>
    %124 = tpu.matmul %114, %123, %cst_85 {dimension_numbers = #tpu.dot_dimension_numbers<[2], [1], [1], [2], [0, 0, 0, 1, 1, 2], [0], [0]>} : vector<4x8x32xf32>, vector<4x32x8xf32>, vector<4x8x8xf32> -> vector<4x8x8xf32>
    "tpu.trace_stop"() : () -> ()
    %c1_86 = arith.constant 1 : index
    %c1_87 = arith.constant 1 : index
    %c0_88 = arith.constant 0 : index
    %c0_89 = arith.constant 0 : index
    %c0_90 = arith.constant 0 : index
    %125 = vector.load %arg6[%c1_86, %c1_87, %c0_88, %c0_89, %c0_90] : memref<2x3x4x1x8xf32, #tpu.memory_space<vmem>>, vector<1x1x4x1x8xf32>
    %126 = vector.shape_cast %125 : vector<1x1x4x1x8xf32> to vector<4x1x8xf32>
    %127 = vector.broadcast %126 : vector<4x1x8xf32> to vector<4x8x8xf32>
    %128 = arith.addf %124, %127 : vector<4x8x8xf32>
    %c1_91 = arith.constant 1 : index
    %c2_92 = arith.constant 2 : index
    %c0_93 = arith.constant 0 : index
    %c0_94 = arith.constant 0 : index
    %c0_95 = arith.constant 0 : index
    %129 = vector.load %arg5[%c1_91, %c2_92, %c0_93, %c0_94, %c0_95] : memref<2x3x4x32x8xf32, #tpu.memory_space<vmem>>, vector<1x1x4x32x8xf32>
    %130 = vector.shape_cast %129 : vector<1x1x4x32x8xf32> to vector<4x32x8xf32>
    "tpu.trace_start"() <{level = 10 : i32, message = "htd,hde->hte"}> : () -> ()
    %cst_96 = arith.constant dense<0.000000e+00> : vector<4x8x8xf32>
    %131 = tpu.matmul %114, %130, %cst_96 {dimension_numbers = #tpu.dot_dimension_numbers<[2], [1], [1], [2], [0, 0, 0, 1, 1, 2], [0], [0]>} : vector<4x8x32xf32>, vector<4x32x8xf32>, vector<4x8x8xf32> -> vector<4x8x8xf32>
    "tpu.trace_stop"() : () -> ()
    %c1_97 = arith.constant 1 : index
    %c2_98 = arith.constant 2 : index
    %c0_99 = arith.constant 0 : index
    %c0_100 = arith.constant 0 : index
    %c0_101 = arith.constant 0 : index
    %132 = vector.load %arg6[%c1_97, %c2_98, %c0_99, %c0_100, %c0_101] : memref<2x3x4x1x8xf32, #tpu.memory_space<vmem>>, vector<1x1x4x1x8xf32>
    %133 = vector.shape_cast %132 : vector<1x1x4x1x8xf32> to vector<4x1x8xf32>
    %134 = vector.broadcast %133 : vector<4x1x8xf32> to vector<4x8x8xf32>
    %135 = arith.addf %131, %134 : vector<4x8x8xf32>
    %136 = arith.mulf %121, %121 : vector<4x8x8xf32>
    %cst_102 = arith.constant dense<0.000000e+00> : vector<4x8xf32>
    %137 = vector.multi_reduction <add>, %136, %cst_102 [2] : vector<4x8x8xf32> to vector<4x8xf32>
    %138 = vector.shape_cast %137 : vector<4x8xf32> to vector<4x8x1xf32>
    %139 = math.sqrt %138 : vector<4x8x1xf32>
    %cst_103 = arith.constant 9.99999996E-13 : f32
    %140 = vector.broadcast %cst_103 : f32 to vector<4x8x1xf32>
    %141 = arith.maximumf %139, %140 : vector<4x8x1xf32>
    %142 = tpu.reciprocal %141 {approx = true} : vector<4x8x1xf32> -> vector<4x8x1xf32>
    %143 = vector.broadcast %142 : vector<4x8x1xf32> to vector<4x8x8xf32>
    %144 = arith.mulf %121, %143 : vector<4x8x8xf32>
    %145 = arith.mulf %128, %128 : vector<4x8x8xf32>
    %cst_104 = arith.constant dense<0.000000e+00> : vector<4x8xf32>
    %146 = vector.multi_reduction <add>, %145, %cst_104 [2] : vector<4x8x8xf32> to vector<4x8xf32>
    %147 = vector.shape_cast %146 : vector<4x8xf32> to vector<4x8x1xf32>
    %148 = math.sqrt %147 : vector<4x8x1xf32>
    %cst_105 = arith.constant 9.99999996E-13 : f32
    %149 = vector.broadcast %cst_105 : f32 to vector<4x8x1xf32>
    %150 = arith.maximumf %148, %149 : vector<4x8x1xf32>
    %151 = tpu.reciprocal %150 {approx = true} : vector<4x8x1xf32> -> vector<4x8x1xf32>
    %152 = vector.broadcast %151 : vector<4x8x1xf32> to vector<4x8x8xf32>
    %153 = arith.mulf %128, %152 : vector<4x8x8xf32>
    "tpu.trace_start"() <{level = 10 : i32, message = "hqe,hke->hqk"}> : () -> ()
    %cst_106 = arith.constant dense<0.000000e+00> : vector<4x8x8xf32>
    %154 = tpu.matmul %144, %153, %cst_106 {dimension_numbers = #tpu.dot_dimension_numbers<[2], [2], [1], [1], [0, 0, 0, 1, 1, 1], [0], [0]>} : vector<4x8x8xf32>, vector<4x8x8xf32>, vector<4x8x8xf32> -> vector<4x8x8xf32>
    "tpu.trace_stop"() : () -> ()
    %cst_107 = arith.constant 13.2732124 : f32
    %155 = vector.broadcast %cst_107 : f32 to vector<4x8x8xf32>
    %156 = arith.mulf %155, %154 : vector<4x8x8xf32>
    %c0_i32_108 = arith.constant 0 : i32
    %157 = vector.broadcast %c0_i32_108 : i32 to vector<1x8xi32>
    %158 = arith.cmpi eq, %7, %157 : vector<1x8xi32>
    %159 = vector.shape_cast %158 : vector<1x8xi1> to vector<1x1x8xi1>
    %cst_109 = arith.constant -9.99999984E+17 : f32
    %160 = vector.shape_cast %159 : vector<1x1x8xi1> to vector<1x1x8xi1>
    %161 = vector.broadcast %160 : vector<1x1x8xi1> to vector<4x8x8xi1>
    %162 = vector.broadcast %cst_109 : f32 to vector<4x8x8xf32>
    %163 = arith.select %161, %162, %156 : vector<4x8x8xi1>, vector<4x8x8xf32>
    %cst_110 = arith.constant dense<0xFF800000> : vector<4x8xf32>
    %164 = vector.multi_reduction <maximumf>, %163, %cst_110 [2] : vector<4x8x8xf32> to vector<4x8xf32>
    %165 = vector.shape_cast %164 : vector<4x8xf32> to vector<4x8x1xf32>
    %166 = vector.broadcast %165 : vector<4x8x1xf32> to vector<4x8x8xf32>
    %167 = arith.subf %163, %166 : vector<4x8x8xf32>
    %168 = math.exp %167 : vector<4x8x8xf32>
    %cst_111 = arith.constant dense<0.000000e+00> : vector<4x8xf32>
    %169 = vector.multi_reduction <add>, %168, %cst_111 [2] : vector<4x8x8xf32> to vector<4x8xf32>
    %170 = vector.shape_cast %169 : vector<4x8xf32> to vector<4x8x1xf32>
    %171 = tpu.reciprocal %170 {approx = true} : vector<4x8x1xf32> -> vector<4x8x1xf32>
    %172 = vector.broadcast %171 : vector<4x8x1xf32> to vector<4x8x8xf32>
    %173 = arith.mulf %168, %172 : vector<4x8x8xf32>
    "tpu.trace_start"() <{level = 10 : i32, message = "hqk,hke->hqe"}> : () -> ()
    %cst_112 = arith.constant dense<0.000000e+00> : vector<4x8x8xf32>
    %174 = tpu.matmul %173, %135, %cst_112 {dimension_numbers = #tpu.dot_dimension_numbers<[2], [1], [1], [2], [0, 0, 0, 1, 1, 2], [0], [0]>} : vector<4x8x8xf32>, vector<4x8x8xf32>, vector<4x8x8xf32> -> vector<4x8x8xf32>
    "tpu.trace_stop"() : () -> ()
    %c1_113 = arith.constant 1 : index
    %c0_114 = arith.constant 0 : index
    %c0_115 = arith.constant 0 : index
    %c0_116 = arith.constant 0 : index
    %175 = vector.load %arg7[%c1_113, %c0_114, %c0_115, %c0_116] : memref<2x4x8x32xf32, #tpu.memory_space<vmem>>, vector<1x4x8x32xf32>
    %176 = vector.shape_cast %175 : vector<1x4x8x32xf32> to vector<4x8x32xf32>
    "tpu.trace_start"() <{level = 10 : i32, message = "hqe,hej->hqj"}> : () -> ()
    %cst_117 = arith.constant dense<0.000000e+00> : vector<4x8x32xf32>
    %177 = tpu.matmul %174, %176, %cst_117 {dimension_numbers = #tpu.dot_dimension_numbers<[2], [1], [1], [2], [0, 0, 0, 1, 1, 2], [0], [0]>} : vector<4x8x8xf32>, vector<4x8x32xf32>, vector<4x8x32xf32> -> vector<4x8x32xf32>
    "tpu.trace_stop"() : () -> ()
    %cst_118 = arith.constant dense<0.000000e+00> : vector<8x32xf32>
    %178 = vector.multi_reduction <add>, %177, %cst_118 [0] : vector<4x8x32xf32> to vector<8x32xf32>
    %c1_119 = arith.constant 1 : index
    %c0_120 = arith.constant 0 : index
    %c0_121 = arith.constant 0 : index
    %179 = vector.load %arg8[%c1_119, %c0_120, %c0_121] : memref<2x1x32xf32, #tpu.memory_space<vmem>>, vector<1x1x32xf32>
    %180 = vector.shape_cast %179 : vector<1x1x32xf32> to vector<1x32xf32>
    %181 = vector.broadcast %180 : vector<1x32xf32> to vector<8x32xf32>
    %182 = arith.addf %178, %181 : vector<8x32xf32>
    %183 = arith.addf %182, %108 : vector<8x32xf32>
    %184 = vector.extract_strided_slice %8 {offsets = [1, 0], sizes = [1, 32], strides = [1, 1]} : vector<3x32xf32> to vector<1x32xf32>
    %185 = vector.extract_strided_slice %9 {offsets = [1, 0], sizes = [1, 32], strides = [1, 1]} : vector<3x32xf32> to vector<1x32xf32>
    %cst_122 = arith.constant dense<0.000000e+00> : vector<8xf32>
    %186 = vector.multi_reduction <add>, %183, %cst_122 [1] : vector<8x32xf32> to vector<8xf32>
    %187 = vector.shape_cast %186 : vector<8xf32> to vector<8x1xf32>
    %cst_123 = arith.constant 3.200000e+01 : f32
    %188 = vector.broadcast %cst_123 : f32 to vector<8x1xf32>
    %189 = arith.divf %187, %188 : vector<8x1xf32>
    %190 = vector.broadcast %189 : vector<8x1xf32> to vector<8x32xf32>
    %191 = arith.subf %183, %190 : vector<8x32xf32>
    %192 = arith.mulf %191, %191 : vector<8x32xf32>
    %cst_124 = arith.constant dense<0.000000e+00> : vector<8xf32>
    %193 = vector.multi_reduction <add>, %192, %cst_124 [1] : vector<8x32xf32> to vector<8xf32>
    %194 = vector.shape_cast %193 : vector<8xf32> to vector<8x1xf32>
    %cst_125 = arith.constant 3.200000e+01 : f32
    %195 = vector.broadcast %cst_125 : f32 to vector<8x1xf32>
    %196 = arith.divf %194, %195 : vector<8x1xf32>
    %197 = vector.broadcast %189 : vector<8x1xf32> to vector<8x32xf32>
    %198 = arith.subf %183, %197 : vector<8x32xf32>
    %cst_126 = arith.constant 9.99999974E-6 : f32
    %199 = vector.broadcast %cst_126 : f32 to vector<8x1xf32>
    %200 = arith.addf %196, %199 : vector<8x1xf32>
    %201 = math.rsqrt %200 : vector<8x1xf32>
    %202 = vector.broadcast %201 : vector<8x1xf32> to vector<8x32xf32>
    %203 = arith.mulf %198, %202 : vector<8x32xf32>
    %204 = vector.broadcast %184 : vector<1x32xf32> to vector<8x32xf32>
    %205 = arith.mulf %203, %204 : vector<8x32xf32>
    %206 = vector.broadcast %185 : vector<1x32xf32> to vector<8x32xf32>
    %207 = arith.addf %205, %206 : vector<8x32xf32>
    %c0_127 = arith.constant 0 : index
    %c0_128 = arith.constant 0 : index
    %208 = vector.load %arg11[%c0_127, %c0_128] : memref<32x64xf32, #tpu.memory_space<vmem>>, vector<32x64xf32>
    %cst_129 = arith.constant dense<0.000000e+00> : vector<8x64xf32>
    %209 = tpu.matmul %207, %208, %cst_129 {dimension_numbers = #tpu.dot_dimension_numbers<[1], [0], [0], [1], [0, 0, 1, 1], [], []>} : vector<8x32xf32>, vector<32x64xf32>, vector<8x64xf32> -> vector<8x64xf32>
    %c0_130 = arith.constant 0 : index
    %c0_131 = arith.constant 0 : index
    %210 = vector.load %arg12[%c0_130, %c0_131] : memref<1x64xf32, #tpu.memory_space<vmem>>, vector<1x64xf32>
    %211 = vector.broadcast %210 : vector<1x64xf32> to vector<8x64xf32>
    %212 = arith.addf %209, %211 : vector<8x64xf32>
    %cst_132 = arith.constant 0.000000e+00 : f32
    %213 = vector.broadcast %cst_132 : f32 to vector<8x64xf32>
    %214 = arith.maximumf %212, %213 : vector<8x64xf32>
    %c0_133 = arith.constant 0 : index
    %c0_134 = arith.constant 0 : index
    %215 = vector.load %arg13[%c0_133, %c0_134] : memref<64x32xf32, #tpu.memory_space<vmem>>, vector<64x32xf32>
    %cst_135 = arith.constant dense<0.000000e+00> : vector<8x32xf32>
    %216 = tpu.matmul %214, %215, %cst_135 {dimension_numbers = #tpu.dot_dimension_numbers<[1], [0], [0], [1], [0, 0, 1, 1], [], []>} : vector<8x64xf32>, vector<64x32xf32>, vector<8x32xf32> -> vector<8x32xf32>
    %c0_136 = arith.constant 0 : index
    %c0_137 = arith.constant 0 : index
    %217 = vector.load %arg14[%c0_136, %c0_137] : memref<1x32xf32, #tpu.memory_space<vmem>>, vector<1x32xf32>
    %218 = vector.broadcast %217 : vector<1x32xf32> to vector<8x32xf32>
    %219 = arith.addf %216, %218 : vector<8x32xf32>
    %220 = arith.addf %219, %207 : vector<8x32xf32>
    %221 = vector.extract_strided_slice %8 {offsets = [2, 0], sizes = [1, 32], strides = [1, 1]} : vector<3x32xf32> to vector<1x32xf32>
    %222 = vector.extract_strided_slice %9 {offsets = [2, 0], sizes = [1, 32], strides = [1, 1]} : vector<3x32xf32> to vector<1x32xf32>
    %cst_138 = arith.constant dense<0.000000e+00> : vector<8xf32>
    %223 = vector.multi_reduction <add>, %220, %cst_138 [1] : vector<8x32xf32> to vector<8xf32>
    %224 = vector.shape_cast %223 : vector<8xf32> to vector<8x1xf32>
    %cst_139 = arith.constant 3.200000e+01 : f32
    %225 = vector.broadcast %cst_139 : f32 to vector<8x1xf32>
    %226 = arith.divf %224, %225 : vector<8x1xf32>
    %227 = vector.broadcast %226 : vector<8x1xf32> to vector<8x32xf32>
    %228 = arith.subf %220, %227 : vector<8x32xf32>
    %229 = arith.mulf %228, %228 : vector<8x32xf32>
    %cst_140 = arith.constant dense<0.000000e+00> : vector<8xf32>
    %230 = vector.multi_reduction <add>, %229, %cst_140 [1] : vector<8x32xf32> to vector<8xf32>
    %231 = vector.shape_cast %230 : vector<8xf32> to vector<8x1xf32>
    %cst_141 = arith.constant 3.200000e+01 : f32
    %232 = vector.broadcast %cst_141 : f32 to vector<8x1xf32>
    %233 = arith.divf %231, %232 : vector<8x1xf32>
    %234 = vector.broadcast %226 : vector<8x1xf32> to vector<8x32xf32>
    %235 = arith.subf %220, %234 : vector<8x32xf32>
    %cst_142 = arith.constant 9.99999974E-6 : f32
    %236 = vector.broadcast %cst_142 : f32 to vector<8x1xf32>
    %237 = arith.addf %233, %236 : vector<8x1xf32>
    %238 = math.rsqrt %237 : vector<8x1xf32>
    %239 = vector.broadcast %238 : vector<8x1xf32> to vector<8x32xf32>
    %240 = arith.mulf %235, %239 : vector<8x32xf32>
    %241 = vector.broadcast %221 : vector<1x32xf32> to vector<8x32xf32>
    %242 = arith.mulf %240, %241 : vector<8x32xf32>
    %243 = vector.broadcast %222 : vector<1x32xf32> to vector<8x32xf32>
    %244 = arith.addf %242, %243 : vector<8x32xf32>
    %c0_143 = arith.constant 0 : index
    %c0_144 = arith.constant 0 : index
    %c0_145 = arith.constant 0 : index
    %245 = vector.load %arg15[%c0_143, %c0_144, %c0_145] : memref<1x8x32xf32, #tpu.memory_space<vmem>>, vector<1x8x32xf32>
    %246 = vector.shape_cast %245 : vector<1x8x32xf32> to vector<8x32xf32>
    %247 = vector.shape_cast %244 : vector<8x32xf32> to vector<1x8x32xf32>
    tpu.vector_store %arg15[%c0_143, %c0_144, %c0_145], %247 {strides = array<i32>} : memref<1x8x32xf32, #tpu.memory_space<vmem>>, vector<1x8x32xf32>,
    %c0_146 = arith.constant 0 : index
    %c0_147 = arith.constant 0 : index
    %c0_148 = arith.constant 0 : index
    %c0_149 = arith.constant 0 : index
    %248 = vector.load %arg16[%c0_146, %c0_147, %c0_148, %c0_149] : memref<1x4x8x8xf32, #tpu.memory_space<vmem>>, vector<1x4x8x8xf32>
    %249 = vector.shape_cast %248 : vector<1x4x8x8xf32> to vector<4x8x8xf32>
    %250 = vector.shape_cast %173 : vector<4x8x8xf32> to vector<1x4x8x8xf32>
    tpu.vector_store %arg16[%c0_146, %c0_147, %c0_148, %c0_149], %250 {strides = array<i32>} : memref<1x4x8x8xf32, #tpu.memory_space<vmem>>, vector<1x4x8x8xf32>,
    return
  }
  func.func @transform_0(%arg0: i32) -> (i32, i32, i32) {
    %c0_i32 = arith.constant 0 : i32
    %c0_i32_0 = arith.constant 0 : i32
    %c0_i32_1 = arith.constant 0 : i32
    return %arg0, %c0_i32, %c0_i32_0 : i32, i32, i32
  }
  func.func @transform_1(%arg0: i32) -> (i32, i32, i32) {
    %c0_i32 = arith.constant 0 : i32
    %c0_i32_0 = arith.constant 0 : i32
    %c0_i32_1 = arith.constant 0 : i32
    return %arg0, %c0_i32, %c0_i32_0 : i32, i32, i32
  }
  func.func @transform_2(%arg0: i32) -> (i32, i32, i32) {
    %c0_i32 = arith.constant 0 : i32
    %c0_i32_0 = arith.constant 0 : i32
    %c0_i32_1 = arith.constant 0 : i32
    return %arg0, %c0_i32, %c0_i32_0 : i32, i32, i32
  }
  func.func @transform_3(%arg0: i32) -> (i32, i32, i32) {
    %c0_i32 = arith.constant 0 : i32
    %c0_i32_0 = arith.constant 0 : i32
    %c0_i32_1 = arith.constant 0 : i32
    return %arg0, %c0_i32, %c0_i32_0 : i32, i32, i32
  }
  func.func @transform_4(%arg0: i32) -> (i32, i32, i32, i32, i32) {
    %c0_i32 = arith.constant 0 : i32
    %c0_i32_0 = arith.constant 0 : i32
    %c0_i32_1 = arith.constant 0 : i32
    %c0_i32_2 = arith.constant 0 : i32
    %c0_i32_3 = arith.constant 0 : i32
    %c0_i32_4 = arith.constant 0 : i32
    return %c0_i32, %c0_i32_0, %c0_i32_1, %c0_i32_2, %c0_i32_3 : i32, i32, i32, i32, i32
  }
  func.func @transform_5(%arg0: i32) -> (i32, i32, i32, i32, i32) {
    %c0_i32 = arith.constant 0 : i32
    %c0_i32_0 = arith.constant 0 : i32
    %c0_i32_1 = arith.constant 0 : i32
    %c0_i32_2 = arith.constant 0 : i32
    %c0_i32_3 = arith.constant 0 : i32
    %c0_i32_4 = arith.constant 0 : i32
    return %c0_i32, %c0_i32_0, %c0_i32_1, %c0_i32_2, %c0_i32_3 : i32, i32, i32, i32, i32
  }
  func.func @transform_6(%arg0: i32) -> (i32, i32, i32, i32) {
    %c0_i32 = arith.constant 0 : i32
    %c0_i32_0 = arith.constant 0 : i32
    %c0_i32_1 = arith.constant 0 : i32
    %c0_i32_2 = arith.constant 0 : i32
    %c0_i32_3 = arith.constant 0 : i32
    return %c0_i32, %c0_i32_0, %c0_i32_1, %c0_i32_2 : i32, i32, i32, i32
  }
  func.func @transform_7(%arg0: i32) -> (i32, i32, i32) {
    %c0_i32 = arith.constant 0 : i32
    %c0_i32_0 = arith.constant 0 : i32
    %c0_i32_1 = arith.constant 0 : i32
    %c0_i32_2 = arith.constant 0 : i32
    return %c0_i32, %c0_i32_0, %c0_i32_1 : i32, i32, i32
  }
  func.func @transform_8(%arg0: i32) -> (i32, i32) {
    %c0_i32 = arith.constant 0 : i32
    %c0_i32_0 = arith.constant 0 : i32
    %c0_i32_1 = arith.constant 0 : i32
    return %c0_i32, %c0_i32_0 : i32, i32
  }
  func.func @transform_9(%arg0: i32) -> (i32, i32) {
    %c0_i32 = arith.constant 0 : i32
    %c0_i32_0 = arith.constant 0 : i32
    %c0_i32_1 = arith.constant 0 : i32
    return %c0_i32, %c0_i32_0 : i32, i32
  }
  func.func @transform_10(%arg0: i32) -> (i32, i32) {
    %c0_i32 = arith.constant 0 : i32
    %c0_i32_0 = arith.constant 0 : i32
    %c0_i32_1 = arith.constant 0 : i32
    return %c0_i32, %c0_i32_0 : i32, i32
  }
  func.func @transform_11(%arg0: i32) -> (i32, i32) {
    %c0_i32 = arith.constant 0 : i32
    %c0_i32_0 = arith.constant 0 : i32
    %c0_i32_1 = arith.constant 0 : i32
    return %c0_i32, %c0_i32_0 : i32, i32
  }
  func.func @transform_12(%arg0: i32) -> (i32, i32) {
    %c0_i32 = arith.constant 0 : i32
    %c0_i32_0 = arith.constant 0 : i32
    %c0_i32_1 = arith.constant 0 : i32
    return %c0_i32, %c0_i32_0 : i32, i32
  }
  func.func @transform_13(%arg0: i32) -> (i32, i32) {
    %c0_i32 = arith.constant 0 : i32
    %c0_i32_0 = arith.constant 0 : i32
    %c0_i32_1 = arith.constant 0 : i32
    return %c0_i32, %c0_i32_0 : i32, i32
  }
  func.func @transform_14(%arg0: i32) -> (i32, i32, i32) {
    %c0_i32 = arith.constant 0 : i32
    %c0_i32_0 = arith.constant 0 : i32
    %c0_i32_1 = arith.constant 0 : i32
    return %arg0, %c0_i32, %c0_i32_0 : i32, i32, i32
  }
  func.func @transform_15(%arg0: i32) -> (i32, i32, i32, i32) {
    %c0_i32 = arith.constant 0 : i32
    %c0_i32_0 = arith.constant 0 : i32
    %c0_i32_1 = arith.constant 0 : i32
    %c0_i32_2 = arith.constant 0 : i32
    return %arg0, %c0_i32, %c0_i32_0, %c0_i32_1 : i32, i32, i32, i32
  }
}

</mosaic_0001>

<bundles_post_ra>
// kernel: decoder_block_forward.1
= control target key start
LH: loop header
LB: loop body
LE: loop exit
PB: predicated region body
PF: predicated region fallthrough
CT: control target
= control target key end

     0   :  { %s7493_s0 = inlined_call_operand.vmem [shape: f32[2,8,32], index: 0, kind: input, shape index: {}]   ;;  %s7494_s1 = inlined_call_operand.hbm [shape: f32[2,8,32], index: 1, kind: input, shape index: {}]   ;;  %s7495_s2 = inlined_call_operand.vmem [shape: s32[2,1,8], index: 2, kind: input, shape index: {}]   ;;  %s7496_s3 = inlined_call_operand.vmem [shape: s32[2,1,8], index: 3, kind: input, shape index: {}]   ;;  %s7497_s4 = inlined_call_operand.hbm [shape: f32[2,3,4,32,8], index: 4, kind: input, shape index: {}]   ;;  %s7498_s5 = inlined_call_operand.hbm [shape: f32[2,3,4,1,8], index: 5, kind: input, shape index: {}]   ;;  %s7499_s6 = inlined_call_operand.hbm [shape: f32[2,4,8,32], index: 6, kind: input, shape index: {}]   ;;  %s7500_s7 = inlined_call_operand.vmem [shape: f32[2,1,32], index: 7, kind: input, shape index: {}]   ;;  %s7501_s8 = inlined_call_operand.vmem [shape: f32[3,32], index: 8, kind: input, shape index: {}]   ;;  %s7502_s9 = inlined_call_operand.vmem [shape: f32[3,32], index: 9, kind: input, shape index: {}]   ;;  %s7503_s10 = inlined_call_operand.vmem [shape: f32[32,64], index: 10, kind: input, shape index: {}]   ;;  %s7504_s11 = inlined_call_operand.vmem [shape: f32[1,64], index: 11, kind: input, shape index: {}]   ;;  %s7505_s12 = inlined_call_operand.hbm [shape: f32[64,32], index: 12, kind: input, shape index: {}]   ;;  %s7506_s13 = inlined_call_operand.vmem [shape: f32[1,32], index: 13, kind: input, shape index: {}]   ;;  %s7507_s14 = inlined_call_operand.hbm [shape: f32[2,8,32], index: 14, kind: output, shape index: {0}]   ;;  %s7508_s15 = inlined_call_operand.hbm [shape: f32[2,4,8,8], index: 15, kind: output, shape index: {1}]  }
   0x1   :  { %7519 = sst [smem:[#allocation19_spill]] %s7493_s0 }
   0x2   :  { %7520 = sst [smem:[#allocation20_spill]] %s7496_s3 }
   0x3   :  { %7521 = sst [smem:[#allocation21_spill]] %s7497_s4 }
   0x4   :  { %7522 = sst [smem:[#allocation22_spill]] %s7502_s9 }
   0x5   :  { %7523 = sst [smem:[#allocation23_spill]] %s7503_s10 }
   0x6   :  { %7524 = sst [smem:[#allocation24_spill]] %s7504_s11 }
   0x7   :  { %7525 = sst [smem:[#allocation25_spill]] %s7506_s13 }
   0x8   :  { %7526 = sst [smem:[#allocation26_spill]] %s7507_s14 }
   0x9   :  { %7527 = sst [smem:[#allocation27_spill]] %s7508_s15 }
   0xa   :  { %21 = vsyncpa [#allocation3], 0 }
   0xb   :  { %23 = vsyncpa [#allocation3 + $0x1], 0 }
   0xc   :  { %24 = vsyncpa [#allocation6], 0 }
   0xd   :  { %25 = vsyncpa [#allocation9], 0 }
   0xe   :  { %26 = vsyncpa [#allocation4], 0 }
   0xf   :  { %28 = vsyncpa [#allocation4 + $0x1], 0 }
  0x10   :  { %29 = vsyncpa [#allocation13], 0 }
  0x11   :  { %31 = vsyncpa [#allocation13 + $0x1], 0  ;;  %s6634_s18 = smov 0   ;;  %s6636_s19 = smov 0  }
  0x12   :  { %s6638_s20 = smov 0   ;;  %s6640_s21 = smov 0  }
  0x13 LB: > { %s6537_s22 = smov [#allocation5]   ;;  %s6655_s24 = sadd.s32 4294967295, %s6535_s21   ;;  %s6535_s21 = sphi %s6640_s21, %s7565_s21   ;;  %s6531_s20 = sphi %s6638_s20, %s7564_s20   ;;  %s6527_s19 = sphi %s6636_s19, %s7563_s19   ;;  %s6523_s18 = sphi %s6634_s18, %s7562_s18  }
  0x14   : > { %s420_s23 = sshll.u32 %s6537_s22, 4  ;;  %p5211_p0 = scmp.ge.s32.totalorder %s6535_s21, 1  ;;  %s6660_s23 = int_to_ptr.vmem [resolvable:$true] %s420_s23 }
  0x15   : > { %p7515_p1 = scmp.eq.s32.totalorder %s6655_s24, 0  ;;  %p408_p2 = scmp.lt.s32.totalorder %s6535_s21, 3 }
  0x16   : > { %s6538_s26 = smov [#allocation8]   ;;  %s6539_s29 = smov [#allocation7]  }
  0x17   : > { %p6662_p3 = pnand %p5211_p0, %p408_p2  ;;  %s446_s27 = sshll.u32 %s6538_s26, 4  ;;  %s6675_s27 = int_to_ptr.vmem [resolvable:$true] %s446_s27 }
  0x18   : > { %s433_s30 = sshll.u32 %s6539_s29, 4  ;;  %s7530_s4 = sld [smem:[#allocation21_spill]]  ;;  %s6677_s30 = int_to_ptr.vmem [resolvable:$true] %s433_s30 }
  0x19   : > { %s7528_s25 = scalar_select %p6662_p3, 1, 0 }
  0x1a   : > { %p6103_p5 = pneg %p6662_p3 }
  0x1c   : > { %p6671_p6 = pnand %p6103_p5, %p7515_p1 }
  0x1e   : > { %s6287_s22 = scalar_lea.hbm %s7530_s4, 12288  ;;  %p6687_p8 = pneg %p6671_p6 }
  0x1f   : > { %p6288_p7 = scmp.ne.s32.totalorder %s7530_s4, %s6287_s22  ;;  %p6294_p11 = scmp.lt.u32.totalorder %s6287_s22, %s7530_s4 }
  0x21   : > { %p6290_p9 = pnand %p6687_p8, %p6288_p7 }
  0x23   : > { %p6291_p10 = pneg %p6290_p9 }
  0x25   : > { %p6296_p12 = pnand %p6294_p11, %p6291_p10 }
  0x27   : > { %6299 = shalt.err (!%p6296_p12)
}
  0x28   : > { %s6300_s14 = scalar_lea.vmem %s6660_s23, 12288  ;;  %p6308_p5 = scmp.lt.s32.totalorder %s6660_s23, %s6660_s23 }
  0x29   : > { %p6301_p13 = scmp.ne.s32.totalorder %s6660_s23, %s6300_s14  ;;  %p6309_p4 = scmp.lt.s32.totalorder %s6300_s14, %s6300_s14 }
  0x2b   : > { %p6303_p0 = pnand %p6301_p13, %p6687_p8  ;;  %p6310_p7 = por %p6309_p4, %p6308_p5 }
  0x2d   : > { %p6304_p2 = pneg %p6303_p0 }
  0x2f   : > { %p6311_p9 = pnand %p6310_p7, %p6304_p2 }
  0x31   : > { %6314 = shalt.err (!%p6311_p9)
}
  0x32   : > { %s7513_s15 = smov 128   ;;  %s7514_s13 = smov 8  }
  0x33   : > { %6106 = dma.hbm_to_vmem [thread:$0]  (!%p6671_p6), %s7530_s4, 12288, %s6660_s23, [#allocation6], %s7513_s15, %s7513_s15, %s7514_s13  }
  0x34   : > { %s6315_s14 = scalar_lea.hbm %s7499_s6, 1024 }
  0x35   : > { %p6316_p4 = scmp.ne.s32.totalorder %s7499_s6, %s6315_s14  ;;  %p6322_p12 = scmp.lt.u32.totalorder %s6315_s14, %s7499_s6 }
  0x37   : > { %p6318_p10 = pnand %p6316_p4, %p6687_p8 }
  0x39   : > { %p6319_p11 = pneg %p6318_p10 }
  0x3b   : > { %p6324_p13 = pnand %p6322_p12, %p6319_p11 }
  0x3d   : > { %6327 = shalt.err (!%p6324_p13)
}
  0x3e   : > { %s6328_s23 = scalar_lea.vmem %s6675_s27, 1024  ;;  %p6336_p7 = scmp.lt.s32.totalorder %s6675_s27, %s6675_s27 }
  0x3f   : > { %p6329_p0 = scmp.ne.s32.totalorder %s6675_s27, %s6328_s23  ;;  %p6337_p9 = scmp.lt.s32.totalorder %s6328_s23, %s6328_s23 }
  0x41   : > { %p6331_p2 = pnand %p6329_p0, %p6687_p8  ;;  %p6338_p4 = por %p6337_p9, %p6336_p7 }
  0x43   : > { %p6332_p5 = pneg %p6331_p2 }
  0x45   : > { %p6339_p10 = pnand %p6338_p4, %p6332_p5 }
  0x47   : > { %6342 = shalt.err (!%p6339_p10)
}
  0x48   : > { %6112 = dma.hbm_to_vmem [thread:$0]  (!%p6671_p6), %s7499_s6, 1024, %s6675_s27, [#allocation9], %s7513_s15, %s7513_s15, %s7514_s13  }
  0x49   : > { %s6343_s16 = scalar_lea.hbm %s7498_s5, 384 }
  0x4a   : > { %p6344_p11 = scmp.ne.s32.totalorder %s7498_s5, %s6343_s16  ;;  %p6350_p0 = scmp.lt.u32.totalorder %s6343_s16, %s7498_s5 }
  0x4c   : > { %p6346_p12 = pnand %p6344_p11, %p6687_p8 }
  0x4e   : > { %p6347_p13 = pneg %p6346_p12 }
  0x50   : > { %p6352_p2 = pnand %p6350_p0, %p6347_p13 }
  0x52   : > { %6355 = shalt.err (!%p6352_p2)
}
  0x53   : > { %s6356_s27 = scalar_lea.vmem %s6677_s30, 384  ;;  %p6364_p4 = scmp.lt.s32.totalorder %s6677_s30, %s6677_s30 }
  0x54   : > { %p6357_p5 = scmp.ne.s32.totalorder %s6677_s30, %s6356_s27  ;;  %p6365_p10 = scmp.lt.s32.totalorder %s6356_s27, %s6356_s27 }
  0x56   : > { %p6359_p7 = pnand %p6357_p5, %p6687_p8  ;;  %p6366_p11 = por %p6365_p10, %p6364_p4 }
  0x58   : > { %p6360_p9 = pneg %p6359_p7 }
  0x5a   : > { %p6367_p12 = pnand %p6366_p11, %p6360_p9 }
  0x5c   : > { %6370 = shalt.err (!%p6367_p12)
}
  0x5d   : > { %s6542_s23 = smov 16   ;;  %s6543_s3 = smov 1  }
  0x5e   : > { %6109 = dma.hbm_to_vmem [thread:$0]  (!%p6671_p6), %s7498_s5, 384, %s6677_s30, [#allocation6], %s6542_s23, %s6542_s23, %s6543_s3  }
  0x5f   : > { %s6544_s11 = smov [#allocation10]   ;;  %s6371_s29 = scalar_lea.hbm %s7505_s12, 1024 }
  0x60   : > { %s474_s16 = sshll.u32 %s6544_s11, 4  ;;  %p6372_p13 = scmp.ne.s32.totalorder %s7505_s12, %s6371_s29  ;;  %s475_s16 = int_to_ptr.vmem [resolvable:$true] %s474_s16 }
  0x61   : > { %p6378_p5 = scmp.lt.u32.totalorder %s6371_s29, %s7505_s12 }
  0x62   : > { %p6374_p0 = pnand %p6372_p13, %p6687_p8 }
  0x64   : > { %p6375_p2 = pneg %p6374_p0 }
  0x66   : > { %p6380_p7 = pnand %p6378_p5, %p6375_p2 }
  0x68   : > { %6383 = shalt.err (!%p6380_p7)
}
  0x69   : > { %s6384_s30 = scalar_lea.vmem %s475_s16, 1024  ;;  %p6392_p11 = scmp.lt.s32.totalorder %s475_s16, %s475_s16 }
  0x6a   : > { %p6385_p9 = scmp.ne.s32.totalorder %s475_s16, %s6384_s30  ;;  %p6393_p12 = scmp.lt.s32.totalorder %s6384_s30, %s6384_s30 }
  0x6c   : > { %p6387_p4 = pnand %p6385_p9, %p6687_p8  ;;  %p6394_p1 = por %p6393_p12, %p6392_p11 }
  0x6e   : > { %p6388_p10 = pneg %p6387_p4 }
  0x70   : > { %p6395_p3 = pnand %p6394_p1, %p6388_p10 }
  0x72   : > { %6398 = shalt.err (!%p6395_p3)
}
  0x73   : > { %s7532_s23 = smov 8   ;;  %s7533_s3 = smov 128  }
  0x74   : > { %6115 = dma.hbm_to_vmem [thread:$0]  (!%p6671_p6), %s7505_s12, 1024, %s475_s16, [#allocation9], %s7533_s3, %s7533_s3, %s7532_s23  }
  0x75   : > { %s5210_s28 = sadd.s32 4294967294, %s6535_s21   ;;  %s6783_s26 = sadd.s32 1, %s6535_s21  }
  0x76   : > { %s67_s9 = ssub.s32 %s6535_s21, %s6783_s26  ;;  %s70_s10 = sadd.s32 1, %s6531_s20 }
  0x77   : > { %p68_p1 = scmp.eq.s32.totalorder %s67_s9, 0  ;;  %p77_p3 = scmp.ne.s32.totalorder %s6531_s20, %s6527_s19 }
  0x78   : > { %p78_p8 = scmp.eq.s32.totalorder %s6535_s21, 0  ;;  %p83_p13 = scmp.ne.s32.totalorder %s6527_s19, %s6523_s18 }
  0x79   : > { %s6794_s11 = scalar_select %p68_p1, %s6531_s20, %s70_s10  }
  0x7a   : > { %p6796_p0 = por %p78_p8, %p77_p3  ;;  %p7535_p2 = scmp.eq.s32.totalorder %s6655_s24, 0 }
  0x7b   : > { %p369_p5 = scmp.eq.s32.totalorder %s6655_s24, 1  ;;  %p375_p7 = scmp.eq.s32.totalorder %s5210_s28, 1 }
  0x7c   : > { %p6802_p6 = por %p7535_p2, %p83_p13  ;;  %p6131_p9 = scmp.lt.s32.totalorder %s6535_s21, 2 }
  0x7d   : > { %s498_s22 = sand.u32 1, %s6531_s20   ;;  %p6809_p4 = por %p369_p5, %p77_p3 }
  0x7e   : > { %p6813_p10 = por %p375_p7, %p83_p13  ;;  %s5217_s27 = sshll.u32 %s498_s22, 3 }
  0x7f   : > { %s7537_s29 = scalar_select %p6809_p4, 1, 0 }
  0x80   : > { %s7538_s14 = scalar_select %p6813_p10, 1, 0 }
  0x81   : > { %s5218_s30 = sshll.u32 %s6535_s21, 7  ;;  %s502_s13 = scalar_lea.vmem [#allocation2], %s5217_s27 }
  0x82   : > { %s6821_s15 = scalar_lea.hbm %s7494_s1, %s5218_s30  ;;  %s509_s28 = sshll.u32 %s502_s13, 4  ;;  %s6823_s28 = int_to_ptr.vmem [resolvable:$true] %s509_s28 }
  0x83   : > { %p6827_p11 = pnand %p6131_p9, %p6796_p0  ;;  %s499_s10 = scalar_lea.sflag [#allocation3], %s498_s22 }
  0x84   : > { %s6399_s4 = scalar_lea.hbm %s6821_s15, 128  ;;  %s6404_s23 = scalar_lea.hbm %s7494_s1, 256 }
  0x85   : > { %p6400_p12 = scmp.ne.s32.totalorder %s6821_s15, %s6399_s4  ;;  %p6401_p1 = pneg %p6827_p11 }
  0x86   : > { %p6405_p13 = scmp.lt.u32.totalorder %s6821_s15, %s7494_s1  ;;  %p6406_p0 = scmp.lt.u32.totalorder %s6404_s23, %s6399_s4 }
  0x87   : > { %p6402_p3 = pnand %p6401_p1, %p6400_p12  ;;  %p6408_p5 = scmp.lt.u32.totalorder %s6399_s4, %s6821_s15 }
  0x88   : > { %p6407_p2 = por %p6406_p0, %p6405_p13 }
  0x89   : > { %p6403_p8 = pneg %p6402_p3 }
  0x8a   : > { %p6409_p7 = por %p6408_p5, %p6407_p2 }
  0x8c   : > { %p6410_p9 = pnand %p6409_p7, %p6403_p8 }
  0x8e   : > { %6413 = shalt.err (!%p6410_p9)
}
  0x8f   : > { %s6414_s22 = scalar_lea.vmem %s6823_s28, 128  ;;  %s6545_s13 = smov [#allocation2]  }
  0x90   : > { %p6415_p12 = scmp.ne.s32.totalorder %s6823_s28, %s6414_s22  ;;  %s6419_s27 = sshll.u32 %s6545_s13, 4  ;;  %s6420_s27 = int_to_ptr.vmem [resolvable:$false] %s6419_s27 }
  0x91   : > { %s6421_s30 = scalar_lea.vmem %s6420_s27, 256  ;;  %p6422_p4 = scmp.lt.s32.totalorder %s6823_s28, %s6420_s27 }
  0x92   : > { %p6417_p3 = pnand %p6415_p12, %p6401_p1  ;;  %p6423_p13 = scmp.lt.s32.totalorder %s6421_s30, %s6414_s22 }
  0x94   : > { %p6418_p10 = pneg %p6417_p3  ;;  %p6424_p0 = por %p6423_p13, %p6422_p4 }
  0x96   : > { %p6425_p2 = pnand %p6424_p0, %p6418_p10 }
  0x98   : > { %6428 = shalt.err (!%p6425_p2)
}
  0x99   : > { %6119 = dma.hbm_to_vmem [thread:$0]  (!%p6827_p11), %s6821_s15, 128, %s6823_s28, %s499_s10  }
  0x9a   : > { %p7540_p8 = scmp.ne.s32.totalorder %s7528_s25, 0 }
  0x9b   : > { %s6859_s4 = sand.u32 (!%p7540_p8), 1, %s6527_s19  }
  0x9c   : > { %530 = sbr.rel (%p7540_p8) target bundleno = 4325 (0x10e5), region = 76  ;;  %s7518_s23 = sshll.u32 (!%p7540_p8), %s6859_s4, 3 }
  0x9d   : > { %s533_s17 = scalar_lea.sflag (!%p7540_p8), [#allocation3], %s6859_s4  ;;  %s6865_s3 = scalar_lea.vmem (!%p7540_p8), [#allocation2], %s7518_s23 }
  0xa3   : > { %6502 = dma.done.wait (%p6802_p6), %s533_s17, 128  }
  0xa4   : > { %6504 = vsyncadd (%p6802_p6), %s533_s17, 4294967168  ;;  %p7541_p4 = scmp.eq.s32.totalorder %s6655_s24, 0 }
  0xa6   : > { %6506 = dma.done.wait (%p7541_p4), [#allocation6], 12672   ;;  %p7542_p10 = pmov %p7541_p4 }
  0xa7   : > { %p7543_p11 = pmov %p7541_p4 }
  0xa8   : > { %6508 = vsyncadd (%p7542_p10), [#allocation6], 4294954624 }
  0xa9   : > { %6510 = dma.done.wait (%p7543_p11), [#allocation9], 2048   ;;  %p7544_p1 = pmov %p7541_p4 }
  0xaa   : > { %p614_p5 = scmp.lt.s32.totalorder %s6655_s24, 1  ;;  %v6546_v0 = vmov 0.0|0.0   ;;  %vm6547_vm0 = vmmov 0   ;;  %v6548_v1 = vmov 0.0   ;;  %v630_v2 = vld [vmem:[#allocation5] sm:$0xff]  ;;  %v631_v3 = vld [vmem:[#allocation5 + $0x8] sm:$0xff] }
  0xab   : > { %6512 = vsyncadd (%p7544_p1), [#allocation9], 4294965248  ;;  %5919 = vmatprep.subr.bf16.mxu0 %v6546_v0  ;;  %5925 = vmatprep.subr.bf16.mxu1 %v6546_v0  ;;  %v634_v4 = vld [vmem:[#allocation5 + $0x20] sm:$0xff]  ;;  %v5920_v5 = vpack.c.bf16 %v631_v3, %v630_v2  ;;  %v635_v6 = vld [vmem:[#allocation5 + $0x28] sm:$0xff]  ;;  %s7545_s0 = sld [smem:[#allocation19_spill]]  ;;  %vm674_vm1 = vcmask 261120  }
  0xac   : > { %5513 = vmatprep.mubr.msk.f32.mxu0 %vm6547_vm0, %v6548_v1  ;;  %5524 = vmatprep.mubr.msk.f32.mxu1 %vm6547_vm0, %v6548_v1  ;;  %s6887_s25 = scalar_select %p614_p5, %s6655_s24, 1  ;;  %v632_v7 = vld [vmem:[#allocation5 + $0x10] sm:$0xff]  ;;  %v633_v8 = vld [vmem:[#allocation5 + $0x18] sm:$0xff]  ;;  %v5926_v9 = vpack.c.bf16 %v635_v6, %v634_v4  ;;  %v638_v14 = vld [vmem:[#allocation5 + $0x40] sm:$0xff]  ;;  %vm1614_vm2 = vcmask 64512  }
  0xad   : > { %v636_v10 = vld [vmem:[#allocation5 + $0x30] sm:$0xff]  ;;  %v637_v11 = vld [vmem:[#allocation5 + $0x38] sm:$0xff]  ;;  %5921 = vmatpush3.bf16.msra.mxu0 %v5920_v5  ;;  %v5923_v12 = vpack.c.bf16 %v633_v8, %v632_v7  ;;  %v639_v15 = vld [vmem:[#allocation5 + $0x48] sm:$0xff]  ;;  %s7549_s22 = sld [smem:[#allocation20_spill]]  ;;  %s7552_s28 = sld [smem:[#allocation23_spill]] }
  0xae   : > { %s5227_s16 = sshll.u32 %s6887_s25, 3  ;;  %5927 = vmatpush3.bf16.msra.mxu1 %v5926_v9  ;;  %5922 = vmatprep.subr.bf16.mxu0 %v6546_v0  ;;  %v5929_v13 = vpack.c.bf16 %v637_v11, %v636_v10  ;;  %v642_v16 = vld [vmem:[#allocation5 + $0x60] sm:$0xff]  ;;  %v643_v17 = vld [vmem:[#allocation5 + $0x68] sm:$0xff]  ;;  %v5932_v19 = vpack.c.bf16 %v639_v15, %v638_v14  ;;  %v640_v21 = vld [vmem:[#allocation5 + $0x50] sm:$0xff]  ;;  %s620_s13 = scalar_lea.vmem %s7495_s2, %s6887_s25 }
  0xaf   : > { %5928 = vmatprep.subr.bf16.mxu1 %v6546_v0  ;;  %v5938_v20 = vpack.c.bf16 %v643_v17, %v642_v16  ;;  %v641_v22 = vld [vmem:[#allocation5 + $0x58] sm:$0xff]  ;;  %v644_v23 = vld [vmem:[#allocation5 + $0x70] sm:$0xff]  ;;  %v959_v27 = vld [vmem:[#allocation5 + $0x80] sm:$0xff]  ;;  %s7553_s15 = sld [smem:[#allocation24_spill]]  ;;  %p7556_p7 = scmp.ne.s32.totalorder %s7537_s29, 0 }
  0xb0   : > { %v645_v24 = vld [vmem:[#allocation5 + $0x78] sm:$0xff]  ;;  %v5935_v25 = vpack.c.bf16 %v641_v22, %v640_v21  ;;  %v960_v28 = vld [vmem:[#allocation5 + $0x88] sm:$0xff]  ;;  %v963_v29 = vld [vmem:[#allocation5 + $0xa0] sm:$0xff] }
  0xb1   : > { %s617_s9 = scalar_lea.vmem %s7545_s0, %s5227_s16  ;;  %5924 = vmatpush3.bf16.msra.mxu0 %v5923_v12  ;;  %v5941_v26 = vpack.c.bf16 %v645_v24, %v644_v23  ;;  %v964_v30 = vld [vmem:[#allocation5 + $0xa8] sm:$0xff]  ;;  %v5944_v31 = vpack.c.bf16 %v960_v28, %v959_v27  ;;  %v961_v33 = vld [vmem:[#allocation5 + $0x90] sm:$0xff]  ;;  %v962_v34 = vld [vmem:[#allocation5 + $0x98] sm:$0xff]  ;;  %s7555_s16 = sld [smem:[#allocation27_spill]] }
  0xb2   : > { %v6895_v18 = vld [vmem:[%s617_s9] sm:$0xff]  ;;  %5930 = vmatpush3.bf16.msra.mxu1 %v5929_v13  ;;  %5931 = vmatprep.subr.bf16.mxu0 %v6546_v0  ;;  %v5950_v32 = vpack.c.bf16 %v964_v30, %v963_v29  ;;  %v966_v36 = vld [vmem:[#allocation5 + $0xb8] sm:$0xff]  ;;  %v5947_v37 = vpack.c.bf16 %v962_v34, %v961_v33  ;;  %v967_v39 = vld [vmem:[#allocation5 + $0xc0] sm:$0xff]  ;;  %s7548_s9 = sld [smem:[#allocation22_spill]] }
  0xb3   : > { %5937 = vmatprep.subr.bf16.mxu1 %v6546_v0  ;;  %v965_v35 = vld [vmem:[#allocation5 + $0xb0] sm:$0xff]  ;;  %v968_v40 = vld [vmem:[#allocation5 + $0xc8] sm:$0xff]  ;;  %v971_v41 = vld [vmem:[#allocation5 + $0xe0] sm:$0xff] }
  0xb4   : > { %5514 = vmatmul.mubr.msk.f32.vlgmr.msra.gmra.mrb[0].mxu0 %vm674_vm1, %v6895_v18  ;;  %v5953_v38 = vpack.c.bf16 %v966_v36, %v965_v35  ;;  %v972_v42 = vld [vmem:[#allocation5 + $0xe8] sm:$0xff]  ;;  %v5956_v43 = vpack.c.bf16 %v968_v40, %v967_v39  ;;  %v969_v45 = vld [vmem:[#allocation5 + $0xd0] sm:$0xff]  ;;  %v970_v46 = vld [vmem:[#allocation5 + $0xd8] sm:$0xff] }
  0xb5   : > { %5525 = vmatmul.mubr.msk.f32.vlgmr.msra.gmra.mrb[0].mxu1 %vm674_vm1, %v6895_v18  ;;  %5933 = vmatpush3.bf16.msra.mxu0 %v5932_v19  ;;  %v5962_v44 = vpack.c.bf16 %v972_v42, %v971_v41  ;;  %v973_v47 = vld [vmem:[#allocation5 + $0xf0] sm:$0xff]  ;;  %v974_v48 = vld [vmem:[#allocation5 + $0xf8] sm:$0xff]  ;;  %v5959_v49 = vpack.c.bf16 %v970_v46, %v969_v45  ;;  %v5228_v59 = vld [vmem:[#allocation7] ss:$0 sm:$0xff] }
  0xb6   : > { %5939 = vmatpush3.bf16.msra.mxu1 %v5938_v20  ;;  %5934 = vmatprep.subr.bf16.mxu0 %v6546_v0  ;;  %v5965_v50 = vpack.c.bf16 %v974_v48, %v973_v47  ;;  %v5236_v60 = vld [vmem:[#allocation7 + $0x4] ss:$0 sm:$0xff]  ;;  %v5229_v61 = vld [vmem:[#allocation7 + $0x1] ss:$0 sm:$0xff]  ;;  %v5237_v62 = vld [vmem:[#allocation7 + $0x5] ss:$0 sm:$0xff] }
  0xb7   : > { %5940 = vmatprep.subr.bf16.mxu1 %v6546_v0  ;;  %5535 = vmatprep.mubr.msk.f32.mxu0 %vm6547_vm0, %v6548_v1  ;;  %v5230_v13 = vld [vmem:[#allocation7 + $0x2] ss:$0 sm:$0xff]  ;;  %v5238_v15 = vld [vmem:[#allocation7 + $0x6] ss:$0 sm:$0xff]  ;;  %v5231_v17 = vld [vmem:[#allocation7 + $0x3] ss:$0 sm:$0xff] }
  0xb8   : > { %5546 = vmatprep.mubr.msk.f32.mxu1 %vm6547_vm0, %v6548_v1  ;;  %v5239_v19 = vld [vmem:[#allocation7 + $0x7] ss:$0 sm:$0xff]  ;;  %v1286_v39 = vld [vmem:[#allocation5 + $0x108] sm:$0xff]  ;;  %v1287_v41 = vld [vmem:[#allocation5 + $0x110] sm:$0xff] }
  0xb9   : > { %5936 = vmatpush3.bf16.msra.mxu0 %v5935_v25  ;;  %v1288_v42 = vld [vmem:[#allocation5 + $0x118] sm:$0xff]  ;;  %v1290_v45 = vld [vmem:[#allocation5 + $0x128] sm:$0xff]  ;;  %v1293_v46 = vld [vmem:[#allocation5 + $0x140] sm:$0xff] }
  0xba   : > { %5942 = vmatpush3.bf16.msra.mxu1 %v5941_v26  ;;  %5943 = vmatprep.subr.bf16.mxu0 %v6546_v0  ;;  %v1294_v48 = vld [vmem:[#allocation5 + $0x148] sm:$0xff] }
  0xbb   : > { %5949 = vmatprep.subr.bf16.mxu1 %v6546_v0 }
  0xbc   : > { %5536 = vmatmul.mubr.msk.f32.vlgmr.msra.gmra.mrb[2].mxu0 %vm674_vm1, %v6895_v18 }
  0xbd   : > { %5547 = vmatmul.mubr.msk.f32.vlgmr.msra.gmra.mrb[2].mxu1 %vm674_vm1, %v6895_v18  ;;  %5945 = vmatpush3.bf16.msra.mxu0 %v5944_v31 }
  0xbe   : > { %5951 = vmatpush3.bf16.msra.mxu1 %v5950_v32  ;;  %5946 = vmatprep.subr.bf16.mxu0 %v6546_v0 }
  0xbf   : > { %5952 = vmatprep.subr.bf16.mxu1 %v6546_v0  ;;  %5557 = vmatprep.mubr.msk.f32.mxu0 %vm6547_vm0, %v6548_v1 }
  0xc0   : > { %5568 = vmatprep.mubr.msk.f32.mxu1 %vm6547_vm0, %v6548_v1 }
  0xc1   : > { %5948 = vmatpush3.bf16.msra.mxu0 %v5947_v37 }
  0xc2   : > { %5954 = vmatpush3.bf16.msra.mxu1 %v5953_v38  ;;  %5955 = vmatprep.subr.bf16.mxu0 %v6546_v0  ;;  %v1285_v38 = vld [vmem:[#allocation5 + $0x100] sm:$0xff] }
  0xc3   : > { %5961 = vmatprep.subr.bf16.mxu1 %v6546_v0  ;;  %v5968_v40 = vpack.c.bf16 %v1286_v39, %v1285_v38 }
  0xc4   : > { %5558 = vmatmul.mubr.msk.f32.vlgmr.msra.gmra.mrb[4].mxu0 %vm674_vm1, %v6895_v18 }
  0xc5   : > { %5569 = vmatmul.mubr.msk.f32.vlgmr.msra.gmra.mrb[4].mxu1 %vm674_vm1, %v6895_v18  ;;  %5957 = vmatpush3.bf16.msra.mxu0 %v5956_v43  ;;  %v5971_v43 = vpack.c.bf16 %v1288_v42, %v1287_v41 }
  0xc6   : > { %5963 = vmatpush3.bf16.msra.mxu1 %v5962_v44  ;;  %5958 = vmatprep.subr.bf16.mxu0 %v6546_v0  ;;  %v1289_v44 = vld [vmem:[#allocation5 + $0x120] sm:$0xff] }
  0xc7   : > { %5964 = vmatprep.subr.bf16.mxu1 %v6546_v0  ;;  %5579 = vmatprep.mubr.msk.f32.mxu0 %vm6547_vm0, %v6548_v1  ;;  %v5974_v47 = vpack.c.bf16 %v1290_v45, %v1289_v44 }
  0xc8   : > { %5590 = vmatprep.mubr.msk.f32.mxu1 %vm6547_vm0, %v6548_v1 }
  0xc9   : > { %5960 = vmatpush3.bf16.msra.mxu0 %v5959_v49  ;;  %v5980_v49 = vpack.c.bf16 %v1294_v48, %v1293_v46 }
  0xca   : > { %5966 = vmatpush3.bf16.msra.mxu1 %v5965_v50  ;;  %5967 = vmatprep.subr.bf16.mxu0 %v6546_v0  ;;  %v1291_v50 = vld [vmem:[#allocation5 + $0x130] sm:$0xff] }
  0xcb   : > { %5973 = vmatprep.subr.bf16.mxu1 %v6546_v0 }
  0xcc   : > { %5580 = vmatmul.mubr.msk.f32.vlgmr.msra.gmra.mrb[6].mxu0 %vm674_vm1, %v6895_v18 }
  0xcd   : > { %5591 = vmatmul.mubr.msk.f32.vlgmr.msra.gmra.mrb[6].mxu1 %vm674_vm1, %v6895_v18  ;;  %5601 = vmatprep.mubr.msk.f32.mxu0 %vm6547_vm0, %v6548_v1 }
  0xce   : > { %5612 = vmatprep.mubr.msk.f32.mxu1 %vm6547_vm0, %v6548_v1  ;;  %5969 = vmatpush3.bf16.msra.mxu0 %v5968_v40 }
  0xcf   : > { %5970 = vmatprep.subr.bf16.mxu0 %v6546_v0  ;;  %5975 = vmatpush3.bf16.msra.mxu1 %v5974_v47 }
  0xd0   : > { %5976 = vmatprep.subr.bf16.mxu1 %v6546_v0 }
  0xd2   : > { %5972 = vmatpush3.bf16.msra.mxu0 %v5971_v43 }
  0xd3   : > { %5979 = vmatprep.subr.bf16.mxu0 %v6546_v0 }
  0xd5   : > { %5602 = vmatmul.mubr.msk.f32.vlgmr.msra.gmra.mrb[8].mxu0 %vm674_vm1, %v6895_v18 }
  0xd6   : > { %5623 = vmatprep.mubr.msk.f32.mxu0 %vm6547_vm0, %v6548_v1  ;;  %5981 = vmatpush3.bf16.msra.mxu0 %v5980_v49 }
  0xd7   : > { %5982 = vmatprep.subr.bf16.mxu0 %v6546_v0 }
 0x187   : > { %v744_v51 = vpop.f32.mrb[0].mxu0 }
 0x188   : > { %v5515_v52 = vpop.f32.mrb[1].mxu0  ;;  %v814_v53 = vpop.f32.mrb[0].mxu1  ;;  %v6943_v2 = vadd.f32 %v5228_v59, %v744_v51  ;;  %v1292_v51 = vld [vmem:[#allocation5 + $0x138] sm:$0xff]  ;;  %v1299_v59 = vld [vmem:[#allocation5 + $0x170] sm:$0xff] }
 0x189   : > { %v5526_v54 = vpop.f32.mrb[1].mxu1  ;;  %v6947_v6 = vadd.f32 %v5229_v61, %v814_v53  ;;  %v1295_v52 = vld [vmem:[#allocation5 + $0x150] sm:$0xff]  ;;  %v5977_v53 = vpack.c.bf16 %v1292_v51, %v1291_v50 }
 0x18a   : > { %v1610_v12 = vmul.f32 %v6943_v2, %v6943_v2  ;;  %v1296_v54 = vld [vmem:[#allocation5 + $0x158] sm:$0xff] }
 0x18b   : > { %v1611_v16 = vmul.f32 %v6947_v6, %v6947_v6  ;;  %5978 = vmatpush3.bf16.msra.mxu1 %v5977_v53 }
 0x18c   : > { %v1615_v25 = vsel %vm1614_vm2, %v1610_v12, 0.0  ;;  %5985 = vmatprep.subr.bf16.mxu1 %v6546_v0 }
 0x18d   : > { %v1618_v28 = vsel %vm1614_vm2, %v1611_v16, 0.0 }
 0x18e   : > { %5613 = vmatmul.mubr.msk.f32.vlgmr.msra.gmra.mrb[8].mxu1 %vm674_vm1, %v6895_v18 }
 0x18f   : > { %v884_v55 = vpop.f32.mrb[2].mxu0  ;;  %5634 = vmatprep.mubr.msk.f32.mxu1 %vm6547_vm0, %v6548_v1 }
 0x190   : > { %v5537_v56 = vpop.f32.mrb[3].mxu0  ;;  %v954_v57 = vpop.f32.mrb[2].mxu1  ;;  %v6961_v21 = vadd.f32 %v5230_v13, %v884_v55  ;;  %v5983_v55 = vpack.c.bf16 %v1296_v54, %v1295_v52 }
 0x191   : > { %v5548_v58 = vpop.f32.mrb[3].mxu1  ;;  %v6966_v26 = vadd.f32 %v5231_v17, %v954_v57  ;;  %v1297_v56 = vld [vmem:[#allocation5 + $0x160] sm:$0xff]  ;;  %v1298_v57 = vld [vmem:[#allocation5 + $0x168] sm:$0xff] }
 0x192   : > { %v1612_v33 = vmul.f32 %v6961_v21, %v6961_v21  ;;  %5984 = vmatpush3.bf16.msra.mxu0 %v5983_v55  ;;  %v5986_v58 = vpack.c.bf16 %v1298_v57, %v1297_v56 }
 0x193   : > { %v1613_v35 = vmul.f32 %v6966_v26, %v6966_v26  ;;  %5637 = vmatprep.subr.mxu0 %v6548_v1 }
 0x194   : > { %v1621_v36 = vsel %vm1614_vm2, %v1612_v33, 0.0  ;;  %5987 = vmatpush3.bf16.msra.mxu1 %v5986_v58 }
 0x195   : > { %v1624_v37 = vsel %vm1614_vm2, %v1613_v35, 0.0  ;;  %5624 = vmatmul.mubr.msk.f32.vlgmr.msra.gmra.mrb[10].mxu0 %vm674_vm1, %v6895_v18  ;;  %5988 = vmatprep.subr.bf16.mxu1 %v6546_v0 }
 0x196   : > { %5639 = vmatprep.mubr.msk.f32.mxu0 %vm6547_vm0, %v6548_v1 }
 0x197   : > { %v1070_v63 = vpop.f32.mrb[4].mxu0 }
 0x198   : > { %v6945_v3 = vadd.f32 %v5236_v60, %v1070_v63  ;;  %v1140_v4 = vpop.f32.mrb[4].mxu1  ;;  %v5559_v5 = vpop.f32.mrb[5].mxu0  ;;  %v1300_v60 = vld [vmem:[#allocation5 + $0x178] sm:$0xff] }
 0x199   : > { %v6949_v7 = vadd.f32 %v5237_v62, %v1140_v4  ;;  %v5570_v8 = vpop.f32.mrb[5].mxu1  ;;  %v5989_v61 = vpack.c.bf16 %v1300_v60, %v1299_v59 }
 0x19a   : > { %v1667_v9 = vmul.f32 %v6945_v3, %v6945_v3 }
 0x19b   : > { %v1668_v10 = vmul.f32 %v6949_v7, %v6949_v7  ;;  %5990 = vmatpush3.bf16.msra.mxu1 %v5989_v61 }
 0x19c   : > { %v1671_v11 = vsel %vm1614_vm2, %v1667_v9, 0.0  ;;  %5652 = vmatprep.subr.mxu1 %v6548_v1 }
 0x19d   : > { %v1674_v14 = vsel %vm1614_vm2, %v1668_v10, 0.0  ;;  %1672 = vadd.xlane.f32.xlu0 %v1671_v11 }
 0x19e   : > { %1675 = vadd.xlane.f32.xlu1 %v1674_v14  ;;  %5635 = vmatmul.mubr.msk.f32.vlgmr.msra.gmra.mrb[10].mxu1 %vm674_vm1, %v6895_v18 }
 0x19f   : > { %v1210_v20 = vpop.f32.mrb[6].mxu0  ;;  %5654 = vmatprep.mubr.msk.f32.mxu1 %vm6547_vm0, %v6548_v1 }
 0x1a0   : > { %v6963_v22 = vadd.f32 %v5238_v15, %v1210_v20  ;;  %v1280_v23 = vpop.f32.mrb[6].mxu1  ;;  %v5581_v24 = vpop.f32.mrb[7].mxu0 }
 0x1a1   : > { %v6968_v27 = vadd.f32 %v5239_v19, %v1280_v23  ;;  %v5592_v29 = vpop.f32.mrb[7].mxu1  ;;  %1616 = vadd.xlane.f32.xlu0 %v1615_v25 }
 0x1a2   : > { %1619 = vadd.xlane.f32.xlu1 %v1618_v28  ;;  %v1669_v30 = vmul.f32 %v6963_v22, %v6963_v22 }
 0x1a3   : > { %v1670_v31 = vmul.f32 %v6968_v27, %v6968_v27 }
 0x1a4   : > { %v1677_v32 = vsel %vm1614_vm2, %v1669_v30, 0.0 }
 0x1a5   : > { %v1680_v34 = vsel %vm1614_vm2, %v1670_v31, 0.0  ;;  %1678 = vadd.xlane.f32.xlu0 %v1677_v32 }
 0x1a6   : > { %1681 = vadd.xlane.f32.xlu1 %v1680_v34 }
 0x1a9   : > { %1622 = vadd.xlane.f32.xlu0 %v1621_v36 }
 0x1aa   : > { %1625 = vadd.xlane.f32.xlu1 %v1624_v37 }
 0x22a   : > { %v1673_v62 = vpop.xlane.xlu0 %1672 }
 0x22b   : > { %v1676_v63 = vpop.xlane.xlu1 %1675  ;;  %6183 = vrsqrt.f32 %v1673_v62  ;;  %vm1685_vm3 = vcmp.eq.f32.partialorder %v1673_v62, inf  ;;  %vm1687_vm4 = vcmp.eq.f32.partialorder %v1673_v62, 0.0  ;;  %v1688_v15 = vand.u32 2147483648, %v1673_v62 }
 0x22c   : > { %6185 = vrsqrt.f32 %v1676_v63  ;;  %vm1692_vm5 = vcmp.eq.f32.partialorder %v1676_v63, inf  ;;  %v1695_v17 = vand.u32 2147483648, %v1676_v63  ;;  %vm1694_vm6 = vcmp.eq.f32.partialorder %v1676_v63, 0.0 }
 0x22e   : > { %v1617_v4 = vpop.xlane.xlu0 %1616 }
 0x22f   : > { %v1620_v5 = vpop.xlane.xlu1 %1619  ;;  %6187 = vrsqrt.f32 %v1617_v4  ;;  %vm1629_vm7 = vcmp.eq.f32.partialorder %v1617_v4, inf  ;;  %vm1631_vm8 = vcmp.eq.f32.partialorder %v1617_v4, 0.0  ;;  %v1632_v33 = vand.u32 2147483648, %v1617_v4 }
 0x230   : > { %6189 = vrsqrt.f32 %v1620_v5  ;;  %vm1636_vm9 = vcmp.eq.f32.partialorder %v1620_v5, inf  ;;  %v1639_v34 = vand.u32 2147483648, %v1620_v5  ;;  %vm1638_vm10 = vcmp.eq.f32.partialorder %v1620_v5, 0.0 }
 0x232   : > { %v1679_v8 = vpop.xlane.xlu0 %1678 }
 0x233   : > { %v1682_v9 = vpop.xlane.xlu1 %1681  ;;  %6191 = vrsqrt.f32 %v1679_v8  ;;  %vm1699_vm11 = vcmp.eq.f32.partialorder %v1679_v8, inf  ;;  %vm1701_vm12 = vcmp.eq.f32.partialorder %v1679_v8, 0.0  ;;  %v1702_v45 = vand.u32 2147483648, %v1679_v8 }
 0x234   : > { %6193 = vrsqrt.f32 %v1682_v9  ;;  %vm1706_vm13 = vcmp.eq.f32.partialorder %v1682_v9, inf  ;;  %v1709_v46 = vand.u32 2147483648, %v1682_v9  ;;  %vm1708_vm14 = vcmp.eq.f32.partialorder %v1682_v9, 0.0 }
 0x235   : > { %v6184_v10 = vpop.eup %6183 }
 0x236   : > { %v6186_v11 = vpop.eup %6185  ;;  %v1684_v12 = vmul.f32 %v6184_v10, %v1673_v62  ;;  %v7007_v13 = vpop.xlane.xlu0 %1622 }
 0x237   : > { %v1691_v14 = vmul.f32 %v6186_v11, %v1676_v63  ;;  %v7009_v16 = vpop.xlane.xlu1 %1625  ;;  %6195 = vrsqrt.f32 %v7007_v13  ;;  %vm1643_vm15 = vcmp.eq.f32.partialorder %v7007_v13, inf  ;;  %v1646_v57 = vand.u32 2147483648, %v7007_v13 }
 0x238   : > { %v1686_v19 = vsel %vm1685_vm3, %v1673_v62, %v1684_v12  ;;  %6197 = vrsqrt.f32 %v7009_v16  ;;  %vm1645_vm3 = vcmp.eq.f32.partialorder %v7007_v13, 0.0  ;;  %v1653_v58 = vand.u32 2147483648, %v7009_v16 }
 0x239   : > { %v6188_v20 = vpop.eup %6187  ;;  %v1693_v23 = vsel %vm1692_vm5, %v1676_v63, %v1691_v14  ;;  %v1689_v24 = vsel %vm1687_vm4, %v1688_v15, %v1686_v19  ;;  %vm1650_vm4 = vcmp.eq.f32.partialorder %v7009_v16, inf  ;;  %vm1652_vm5 = vcmp.eq.f32.partialorder %v7009_v16, 0.0 }
 0x23a   : > { %v6190_v25 = vpop.eup %6189  ;;  %v1696_v28 = vsel %vm1694_vm6, %v1695_v17, %v1693_v23  ;;  %v1711_v29 = vmax.f32 %v1689_v24, 1e-12  ;;  %v1628_v30 = vmul.f32 %v6188_v20, %v1617_v4 }
 0x23b   : > { %v1712_v31 = vmax.f32 %v1696_v28, 1e-12  ;;  %v1635_v32 = vmul.f32 %v6190_v25, %v1620_v5 }
 0x23c   : > { %6199 = vrcp.f32 %v1711_v29  ;;  %v1630_v35 = vsel %vm1629_vm7, %v1617_v4, %v1628_v30 }
 0x23d   : > { %v6192_v36 = vpop.eup %6191  ;;  %v1637_v37 = vsel %vm1636_vm9, %v1620_v5, %v1635_v32  ;;  %v1633_v38 = vsel %vm1631_vm8, %v1632_v33, %v1630_v35  ;;  %6201 = vrcp.f32 %v1712_v31  ;;  %v2033_v32 = vlaneseq  ;;  %v626_v33 = vld [vmem:[%s620_s13] sm:$0x1]  ;;  %s623_s13 = scalar_lea.vmem %s7549_s22, %s6887_s25  ;;  %s5226_s25 = sshll.u32 %s6859_s4, 5 }
 0x23e   : > { %v6194_v39 = vpop.eup %6193  ;;  %v1640_v40 = vsel %vm1638_vm10, %v1639_v34, %v1637_v37  ;;  %v1655_v41 = vmax.f32 %v1633_v38, 1e-12  ;;  %v1698_v42 = vmul.f32 %v6192_v36, %v1679_v8  ;;  %vm2031_vm6 = vcmp.eq.s32.totalorder %v626_v33, 0  ;;  %s7324_s27 = scalar_lea.vmem [#allocation12], %s5226_s25  ;;  %s7554_s22 = sld [smem:[#allocation25_spill]] }
 0x23f   : > { %v1656_v43 = vmax.f32 %v1640_v40, 1e-12  ;;  %v1705_v44 = vmul.f32 %v6194_v39, %v1682_v9  ;;  %v7061_v34 = vshrl.u32 %v2033_v32, 7  ;;  %v6549_v36 = vmov 0   ;;  %v2380_v40 = vld [vmem:[#allocation8 + $0x10] sm:$0xff]  ;;  %s5037_s25 = sshll.u32 %s7324_s27, 4  ;;  %s7409_s25 = int_to_ptr.vmem [resolvable:$true] %s5037_s25 }
 0x240   : > { %6203 = vrcp.f32 %v1655_v41  ;;  %v1700_v47 = vsel %vm1699_vm11, %v1679_v8, %v1698_v42  ;;  %v2032_v37 = vsel %vm2031_vm6, 1, %v6549_v36  ;;  %s6429_s10 = scalar_lea.vmem %s7409_s25, 512 }
 0x241   : > { %v6196_v48 = vpop.eup %6195  ;;  %v1707_v49 = vsel %vm1706_vm13, %v1682_v9, %v1705_v44  ;;  %v1703_v50 = vsel %vm1701_vm12, %v1702_v45, %v1700_v47  ;;  %6205 = vrcp.f32 %v1656_v43  ;;  %v7064_v35 = vsub.s32 0, %v7061_v34  ;;  %p6430_p6 = scmp.ne.s32.totalorder %s7409_s25, %s6429_s10 }
 0x242   : > { %v6198_v51 = vpop.eup %6197  ;;  %v1710_v52 = vsel %vm1708_vm14, %v1709_v46, %v1707_v49  ;;  %v1713_v53 = vmax.f32 %v1703_v50, 1e-12  ;;  %v1642_v54 = vmul.f32 %v6196_v48, %v7007_v13 }
 0x243   : > { %v1714_v55 = vmax.f32 %v1710_v52, 1e-12  ;;  %v1649_v56 = vmul.f32 %v6198_v51, %v7009_v16  ;;  %v2036_v38 = vrot.slane %v2032_v37, %v7064_v35  ;;  %p6431_p9 = pnand %p6430_p6, %p7556_p7 }
 0x244   : > { %6207 = vrcp.f32 %v1713_v53  ;;  %v1644_v59 = vsel %vm1643_vm15, %v7007_v13, %v1642_v54 }
 0x245   : > { %6209 = vrcp.f32 %v1714_v55  ;;  %v1651_v60 = vsel %vm1650_vm4, %v7009_v16, %v1649_v56  ;;  %v1647_v61 = vsel %vm1645_vm3, %v1646_v57, %v1644_v59  ;;  %vm7068_vm7 = vcmp.eq.s32.totalorder %v2036_v38, 1  ;;  %p6432_p12 = pneg %p6431_p9 }
 0x246   : > { %v6200_v62 = vpop.eup %6199  ;;  %v1654_v63 = vsel %vm1652_vm5, %v1653_v58, %v1651_v60  ;;  %v1657_v4 = vmax.f32 %v1647_v61, 1e-12 }
 0x247   : > { %v1658_v5 = vmax.f32 %v1654_v63, 1e-12  ;;  %v1719_v8 = vmul.f32 %v6200_v62, %v6945_v3  ;;  %v6202_v9 = vpop.eup %6201 }
 0x248   : > { %6211 = vrcp.f32 %v1657_v4  ;;  %v1720_v13 = vmul.f32 %v6202_v9, %v6949_v7 }
 0x249   : > { %6213 = vrcp.f32 %v1658_v5  ;;  %5638 = vmatpush3.xpose.msk.msra.mxu0 %vm1614_vm2, %v1719_v8 }
 0x24a   : > { %v6204_v10 = vpop.eup %6203  ;;  %5642 = vmatprep.subr.mxu0 %v6548_v1 }
 0x24b   : > { %v1663_v11 = vmul.f32 %v6204_v10, %v6943_v2  ;;  %v6206_v12 = vpop.eup %6205 }
 0x24c   : > { %v1664_v15 = vmul.f32 %v6206_v12, %v6947_v6 }
 0x24d   : > { %5640 = vmatmul.mubr.msk.f32.vlgmr.msra.gmra.mrb[12].mxu0 %vm1614_vm2, %v1663_v11 }
 0x24e   : > { %v6208_v14 = vpop.eup %6207  ;;  %5643 = vmatpush3.xpose.msk.msra.mxu0 %vm1614_vm2, %v1720_v13  ;;  %5644 = vmatprep.mubr.msk.f32.mxu0 %vm6547_vm0, %v6548_v1 }
 0x24f   : > { %v6210_v3 = vpop.eup %6209  ;;  %5647 = vmatprep.subr.mxu0 %v6548_v1  ;;  %v1721_v16 = vmul.f32 %v6208_v14, %v6963_v22  ;;  %v5244_v22 = vld [vmem:[#allocation7 + $0x8] ss:$0 sm:$0xff] }
 0x250   : > { %v1722_v2 = vmul.f32 %v6210_v3, %v6968_v27  ;;  %v1396_v27 = vpop.f32.mrb[8].mxu0 }
 0x251   : > { %5645 = vmatmul.mubr.msk.f32.vlgmr.msra.gmra.mrb[14].mxu0 %vm1614_vm2, %v1664_v15  ;;  %v5603_v20 = vpop.f32.mrb[9].mxu0 }
 0x252   : > { %v6212_v7 = vpop.eup %6211  ;;  %5648 = vmatpush3.xpose.msk.msra.mxu0 %vm1614_vm2, %v1721_v16  ;;  %5653 = vmatpush3.xpose.msk.msra.mxu1 %vm1614_vm2, %v1722_v2  ;;  %v5246_v20 = vld [vmem:[#allocation7 + $0xa] ss:$0 sm:$0xff] }
 0x253   : > { %v6214_v17 = vpop.eup %6213  ;;  %5649 = vmatprep.mubr.msk.f32.mxu0 %vm6547_vm0, %v6548_v1  ;;  %v1665_v19 = vmul.f32 %v6212_v7, %v6961_v21  ;;  %5657 = vmatprep.subr.mxu0 %v6548_v1  ;;  %v1397_v21 = vadd.f32 %v5244_v22, %v1396_v27 }
 0x254   : > { %v1666_v6 = vmul.f32 %v6214_v17, %v6966_v26  ;;  %5662 = vmatprep.subr.mxu1 %v6548_v1  ;;  %v5245_v26 = vld [vmem:[#allocation7 + $0x9] ss:$0 sm:$0xff] }
 0x255   : > { %5650 = vmatmul.mubr.msk.f32.vlgmr.msra.gmra.mrb[16].mxu0 %vm1614_vm2, %v1665_v19 }
 0x256   : > { %5655 = vmatmul.mubr.msk.f32.vlgmr.msra.gmra.mrb[12].mxu1 %vm1614_vm2, %v1666_v6  ;;  %5659 = vmatprep.mubr.msk.f32.mxu0 %vm6547_vm0, %v6548_v1 }
 0x257   : > { %5664 = vmatprep.mubr.msk.f32.mxu1 %vm6547_vm0, %v6548_v1  ;;  %5658 = vmatpush3.msra.mxu0 %v1397_v21 }
 0x258   : > { %5667 = vmatprep.subr.mxu0 %v6548_v1 }
 0x261   : > { %v1466_v23 = vpop.f32.mrb[8].mxu1 }
 0x262   : > { %v1467_v24 = vadd.f32 %v5245_v26, %v1466_v23  ;;  %v5614_v25 = vpop.f32.mrb[9].mxu1 }
 0x263   : > { %v5247_v25 = vld [vmem:[#allocation7 + $0xb] ss:$0 sm:$0xff] }
 0x264   : > { %5663 = vmatpush3.msra.mxu1 %v1467_v24 }
 0x265   : > { %5672 = vmatprep.subr.mxu1 %v6548_v1 }
 0x268   : > { %v7052_v28 = vpop.f32.mrb[10].mxu0 }
 0x269   : > { %v5625_v29 = vpop.f32.mrb[11].mxu0  ;;  %v1537_v24 = vadd.f32 %v5246_v20, %v7052_v28 }
 0x271   : > { %v7055_v30 = vpop.f32.mrb[10].mxu1 }
 0x272   : > { %v5636_v31 = vpop.f32.mrb[11].mxu1  ;;  %v1607_v32 = vadd.f32 %v5247_v25, %v7055_v30  ;;  %v2378_v30 = vld [vmem:[#allocation8] sm:$0xff]  ;;  %v7137_v25 = vld [vmem:[%s7501_s8] sm:$0x7] }
 0x320   : > { %v1795_v39 = vpop.f32.mrb[12].mxu0 }
 0x321   : > { %v2027_v41 = vmul.f32 13.273212, %v1795_v39  ;;  %v5641_v42 = vpop.f32.mrb[13].mxu0  ;;  %v2379_v39 = vld [vmem:[#allocation8 + $0x8] sm:$0xff] }
 0x323   : > { %v2038_v43 = vsel %vm7068_vm7, -1e+18, %v2027_v41 }
 0x324   : > { %v1871_v44 = vpop.f32.mrb[14].mxu0  ;;  %v2042_v45 = vsel %vm1614_vm2, %v2038_v43, -inf }
 0x325   : > { %v2028_v46 = vmul.f32 13.273212, %v1871_v44  ;;  %2043 = vmax.xlane.f32.xlu0 %v2042_v45  ;;  %v5646_v47 = vpop.f32.mrb[15].mxu0 }
 0x327   : > { %v2039_v48 = vsel %vm7068_vm7, -1e+18, %v2028_v46 }
 0x328   : > { %v1947_v49 = vpop.f32.mrb[16].mxu0  ;;  %v2045_v50 = vsel %vm1614_vm2, %v2039_v48, -inf }
 0x329   : > { %v2029_v51 = vmul.f32 13.273212, %v1947_v49  ;;  %v2023_v52 = vpop.f32.mrb[12].mxu1  ;;  %2046 = vmax.xlane.f32.xlu1 %v2045_v50  ;;  %v5651_v53 = vpop.f32.mrb[17].mxu0 }
 0x32a   : > { %v2030_v54 = vmul.f32 13.273212, %v2023_v52  ;;  %v5656_v55 = vpop.f32.mrb[13].mxu1 }
 0x32b   : > { %v2040_v56 = vsel %vm7068_vm7, -1e+18, %v2029_v51 }
 0x32c   : > { %v2041_v57 = vsel %vm7068_vm7, -1e+18, %v2030_v54  ;;  %v2048_v58 = vsel %vm1614_vm2, %v2040_v56, -inf }
 0x32d   : > { %v2051_v59 = vsel %vm1614_vm2, %v2041_v57, -inf  ;;  %2049 = vmax.xlane.f32.xlu0 %v2048_v58 }
 0x32e   : > { %2052 = vmax.xlane.f32.xlu1 %v2051_v59 }
 0x3b2   : > { %v2044_v60 = vpop.xlane.xlu0 %2043 }
 0x3b3   : > { %v2054_v61 = vsub.f32 %v2038_v43, %v2044_v60  ;;  %v2381_v43 = vld [vmem:[#allocation8 + $0x18] sm:$0xff] }
 0x3b5   : > { %v2058_v62 = vmul.f32 1.442695, %v2054_v61 }
 0x3b6   : > { %v2047_v63 = vpop.xlane.xlu1 %2046 }
 0x3b7   : > { %6215 = vpow2.f32 %v2058_v62  ;;  %v2055_v4 = vsub.f32 %v2039_v48, %v2047_v63 }
 0x3b9   : > { %v2060_v5 = vmul.f32 1.442695, %v2055_v4  ;;  %v5268_v4 = vld [vmem:[%s7500_s7] ss:$0 sm:$0xff] }
 0x3ba   : > { %v2050_v8 = vpop.xlane.xlu0 %2049 }
 0x3bb   : > { %6217 = vpow2.f32 %v2060_v5  ;;  %v2053_v9 = vpop.xlane.xlu1 %2052  ;;  %v2056_v10 = vsub.f32 %v2040_v56, %v2050_v8 }
 0x3bc   : > { %v2057_v11 = vsub.f32 %v2041_v57, %v2053_v9 }
 0x3bd   : > { %v2062_v12 = vmul.f32 1.442695, %v2056_v10 }
 0x3be   : > { %v2064_v13 = vmul.f32 1.442695, %v2057_v11 }
 0x3bf   : > { %6219 = vpow2.f32 %v2062_v12 }
 0x3c0   : > { %6221 = vpow2.f32 %v2064_v13 }
 0x3c1   : > { %v6216_v14 = vpop.eup %6215 }
 0x3c2   : > { %v2066_v3 = vsel %vm1614_vm2, %v6216_v14, 0.0 }
 0x3c3   : > { %2067 = vadd.xlane.f32.xlu0 %v2066_v3 }
 0x3c5   : > { %v6218_v15 = vpop.eup %6217 }
 0x3c6   : > { %v2069_v16 = vsel %vm1614_vm2, %v6218_v15, 0.0 }
 0x3c7   : > { %2070 = vadd.xlane.f32.xlu1 %v2069_v16  ;;  %v2716_v16 = vld [vmem:[#allocation5 + $0x188] sm:$0xff] }
 0x3c9   : > { %v6220_v2 = vpop.eup %6219 }
 0x3ca   : > { %v6222_v7 = vpop.eup %6221  ;;  %v2072_v17 = vsel %vm1614_vm2, %v6220_v2, 0.0 }
 0x3cb   : > { %v2075_v19 = vsel %vm1614_vm2, %v6222_v7, 0.0  ;;  %2073 = vadd.xlane.f32.xlu0 %v2072_v17  ;;  %v2720_v17 = vld [vmem:[#allocation5 + $0x1a8] sm:$0xff] }
 0x3cc   : > { %2076 = vadd.xlane.f32.xlu1 %v2075_v19 }
 0x450   : > { %v2068_v6 = vpop.xlane.xlu0 %2067 }
 0x451   : > { %6223 = vrcp.f32 %v2068_v6  ;;  %v2717_v6 = vld [vmem:[#allocation5 + $0x190] sm:$0xff] }
 0x454   : > { %v2071_v22 = vpop.xlane.xlu1 %2070 }
 0x455   : > { %6225 = vrcp.f32 %v2071_v22  ;;  %v2718_v22 = vld [vmem:[#allocation5 + $0x198] sm:$0xff] }
 0x458   : > { %v2074_v27 = vpop.xlane.xlu0 %2073 }
 0x459   : > { %v2077_v21 = vpop.xlane.xlu1 %2076  ;;  %6227 = vrcp.f32 %v2074_v27  ;;  %v5995_v27 = vpack.c.bf16 %v2718_v22, %v2717_v6 }
 0x45a   : > { %6229 = vrcp.f32 %v2077_v21  ;;  %v2722_v21 = vld [vmem:[#allocation5 + $0x1b8] sm:$0xff] }
 0x45b   : > { %v6224_v26 = vpop.eup %6223 }
 0x45c   : > { %v2082_v23 = vmul.f32 %v6224_v26, %v6216_v14 }
 0x45e   : > { %5660 = vmatmul.mubr.msk.f32.vlgmr.msra.gmra.mrb[18].mxu0 %vm1614_vm2, %v2082_v23 }
 0x45f   : > { %v6226_v29 = vpop.eup %6225  ;;  %5668 = vmatpush3.msra.mxu0 %v1537_v24  ;;  %5669 = vmatprep.mubr.msk.f32.mxu0 %vm6547_vm0, %v6548_v1 }
 0x460   : > { %v2083_v31 = vmul.f32 %v6226_v29, %v6218_v15  ;;  %5677 = vmatprep.subr.mxu0 %v6548_v1  ;;  %v2715_v15 = vld [vmem:[#allocation5 + $0x180] sm:$0xff]  ;;  %v7142_v29 = vld [vmem:[%s7548_s9] sm:$0x7] }
 0x462   : > { %5665 = vmatmul.mubr.msk.f32.vlgmr.msra.gmra.mrb[14].mxu1 %vm1614_vm2, %v2083_v31  ;;  %v2707_v31 = vrot.slane %v7137_v25, %v7064_v35 }
 0x463   : > { %v6228_v33 = vpop.eup %6227  ;;  %5673 = vmatpush3.msra.mxu1 %v1607_v32  ;;  %5674 = vmatprep.mubr.msk.f32.mxu1 %vm6547_vm0, %v6548_v1 }
 0x464   : > { %v6230_v28 = vpop.eup %6229  ;;  %v2084_v37 = vmul.f32 %v6228_v33, %v6220_v2  ;;  %5682 = vmatprep.subr.mxu1 %v6548_v1  ;;  %v2719_v2 = vld [vmem:[#allocation5 + $0x1a0] sm:$0xff] }
 0x465   : > { %v2085_v38 = vmul.f32 %v6230_v28, %v6222_v7  ;;  %v5992_v7 = vpack.c.bf16 %v2716_v16, %v2715_v15  ;;  %v5998_v19 = vpack.c.bf16 %v2720_v17, %v2719_v2  ;;  %v2723_v33 = vld [vmem:[#allocation5 + $0x1c0] sm:$0xff]  ;;  %v5269_v16 = vld [vmem:[#allocation7 + $0xc] ss:$0 sm:$0xff] }
 0x466   : > { %5670 = vmatmul.mubr.msk.f32.vlgmr.msra.gmra.mrb[20].mxu0 %vm1614_vm2, %v2084_v37  ;;  %v2712_v37 = vrot.slane %v7142_v29, %v7064_v35 }
 0x467   : > { %5675 = vmatmul.mubr.msk.f32.vlgmr.msra.gmra.mrb[16].mxu1 %vm1614_vm2, %v2085_v38  ;;  %5679 = vmatprep.mubr.msk.f32.mxu0 %vm6547_vm0, %v6548_v1  ;;  %v2724_v38 = vld [vmem:[#allocation5 + $0x1c8] sm:$0xff] }
 0x468   : > { %5684 = vmatprep.mubr.msk.f32.mxu1 %vm6547_vm0, %v6548_v1  ;;  %5678 = vmatpush3.msra.mxu0 %v2378_v30  ;;  %v2727_v30 = vld [vmem:[#allocation5 + $0x1e0] sm:$0xff] }
 0x469   : > { %5683 = vmatpush3.msra.mxu1 %v2379_v39  ;;  %5687 = vmatprep.subr.mxu0 %v6548_v1  ;;  %v2728_v39 = vld [vmem:[#allocation5 + $0x1e8] sm:$0xff] }
 0x46a   : > { %5692 = vmatprep.subr.mxu1 %v6548_v1 }
 0x531   : > { %v2155_v41 = vpop.f32.mrb[18].mxu0 }
 0x532   : > { %v5661_v42 = vpop.f32.mrb[19].mxu0  ;;  %5680 = vmatmul.mubr.msk.f32.vlgmr.msra.gmra.mrb[22].mxu0 %vm1614_vm2, %v2155_v41  ;;  %v6004_v41 = vpack.c.bf16 %v2724_v38, %v2723_v33 }
 0x533   : > { %5688 = vmatpush3.msra.mxu0 %v2380_v40  ;;  %5689 = vmatprep.mubr.msk.f32.mxu0 %vm6547_vm0, %v6548_v1  ;;  %v6010_v42 = vpack.c.bf16 %v2728_v39, %v2727_v30 }
 0x534   : > { %5991 = vmatprep.subr.bf16.mxu0 %v6546_v0 }
 0x535   : > { %v2228_v44 = vpop.f32.mrb[14].mxu1 }
 0x536   : > { %v5666_v45 = vpop.f32.mrb[15].mxu1  ;;  %5685 = vmatmul.mubr.msk.f32.vlgmr.msra.gmra.mrb[18].mxu1 %vm1614_vm2, %v2228_v44 }
 0x537   : > { %5693 = vmatpush3.msra.mxu1 %v2381_v43  ;;  %5694 = vmatprep.mubr.msk.f32.mxu1 %vm6547_vm0, %v6548_v1  ;;  %v2725_v43 = vld [vmem:[#allocation5 + $0x1d0] sm:$0xff]  ;;  %v2726_v45 = vld [vmem:[#allocation5 + $0x1d8] sm:$0xff] }
 0x538   : > { %5997 = vmatprep.subr.bf16.mxu1 %v6546_v0 }
 0x539   : > { %v2301_v46 = vpop.f32.mrb[20].mxu0 }
 0x53a   : > { %v2374_v47 = vpop.f32.mrb[16].mxu1  ;;  %v5671_v48 = vpop.f32.mrb[21].mxu0  ;;  %5690 = vmatmul.mubr.msk.f32.vlgmr.msra.gmra.mrb[24].mxu0 %vm1614_vm2, %v2301_v46  ;;  %v2729_v46 = vld [vmem:[#allocation5 + $0x1f0] sm:$0xff] }
 0x53b   : > { %v5676_v49 = vpop.f32.mrb[17].mxu1  ;;  %5695 = vmatmul.mubr.msk.f32.vlgmr.msra.gmra.mrb[20].mxu1 %vm1614_vm2, %v2374_v47  ;;  %5705 = vmatprep.mubr.msk.f32.mxu0 %vm6547_vm0, %v6548_v1  ;;  %v2730_v47 = vld [vmem:[#allocation5 + $0x1f8] sm:$0xff]  ;;  %v6007_v48 = vpack.c.bf16 %v2726_v45, %v2725_v43 }
 0x53c   : > { %5716 = vmatprep.mubr.msk.f32.mxu1 %vm6547_vm0, %v6548_v1  ;;  %5993 = vmatpush3.bf16.msra.mxu0 %v5992_v7  ;;  %v6013_v49 = vpack.c.bf16 %v2730_v47, %v2729_v46 }
 0x53d   : > { %5999 = vmatpush3.bf16.msra.mxu1 %v5998_v19  ;;  %5994 = vmatprep.subr.bf16.mxu0 %v6546_v0 }
 0x53e   : > { %6000 = vmatprep.subr.bf16.mxu1 %v6546_v0 }
 0x540   : > { %5996 = vmatpush3.bf16.msra.mxu0 %v5995_v27 }
 0x541   : > { %6003 = vmatprep.subr.bf16.mxu0 %v6546_v0 }
 0x605   : > { %v2451_v50 = vpop.f32.mrb[22].mxu0 }
 0x606   : > { %v5681_v51 = vpop.f32.mrb[23].mxu0  ;;  %v2674_v53 = vsel %vm674_vm1, %v2451_v50, 0.0  ;;  %v3044_v50 = vld [vmem:[#allocation5 + $0x200] sm:$0xff] }
 0x607   : > { %v3045_v51 = vld [vmem:[#allocation5 + $0x208] sm:$0xff] }
 0x609   : > { %v2524_v52 = vpop.f32.mrb[18].mxu1 }
 0x60a   : > { %v2675_v54 = vsel %vm674_vm1, %v2524_v52, 0.0  ;;  %v5686_v55 = vpop.f32.mrb[19].mxu1  ;;  %v3048_v52 = vld [vmem:[#allocation5 + $0x220] sm:$0xff] }
 0x60b   : > { %v2676_v56 = vadd.f32 %v2675_v54, %v2674_v53  ;;  %v3049_v53 = vld [vmem:[#allocation5 + $0x228] sm:$0xff]  ;;  %v6016_v54 = vpack.c.bf16 %v3045_v51, %v3044_v50 }
 0x60c   : > { %v6022_v55 = vpack.c.bf16 %v3049_v53, %v3048_v52 }
 0x60d   : > { %v2597_v57 = vpop.f32.mrb[24].mxu0 }
 0x60e   : > { %v2677_v58 = vsel %vm674_vm1, %v2597_v57, 0.0  ;;  %v2670_v59 = vpop.f32.mrb[20].mxu1  ;;  %v5691_v60 = vpop.f32.mrb[25].mxu0  ;;  %v3047_v57 = vld [vmem:[#allocation5 + $0x218] sm:$0xff] }
 0x60f   : > { %v2678_v61 = vadd.f32 %v2677_v58, %v2676_v56  ;;  %v5696_v62 = vpop.f32.mrb[21].mxu1  ;;  %v2679_v63 = vsel %vm674_vm1, %v2670_v59, 0.0  ;;  %v3046_v56 = vld [vmem:[#allocation5 + $0x210] sm:$0xff]  ;;  %v3051_v59 = vld [vmem:[#allocation5 + $0x238] sm:$0xff] }
 0x610   : > { %v3050_v58 = vld [vmem:[#allocation5 + $0x230] sm:$0xff]  ;;  %v6019_v60 = vpack.c.bf16 %v3047_v57, %v3046_v56  ;;  %v3052_v62 = vld [vmem:[#allocation5 + $0x240] sm:$0xff] }
 0x611   : > { %v2680_v5 = vadd.f32 %v2679_v63, %v2678_v61  ;;  %v6025_v61 = vpack.c.bf16 %v3051_v59, %v3050_v58  ;;  %v3053_v63 = vld [vmem:[#allocation5 + $0x248] sm:$0xff] }
 0x612   : > { %v5272_v58 = vld [vmem:[#allocation7 + $0xf] ss:$0 sm:$0xff] }
 0x613   : > { %v2688_v8 = vadd.f32 %v5268_v4, %v2680_v5  ;;  %v3056_v4 = vld [vmem:[#allocation5 + $0x260] sm:$0xff]  ;;  %v3057_v5 = vld [vmem:[#allocation5 + $0x268] sm:$0xff] }
 0x615   : > { %v2689_v9 = vadd.f32 %v2688_v8, %v6895_v18  ;;  %v2721_v18 = vld [vmem:[#allocation5 + $0x1b0] sm:$0xff] }
 0x616   : > { %v6001_v20 = vpack.c.bf16 %v2722_v21, %v2721_v18  ;;  %v7173_v8 = vld [vmem:[%s6865_s3] sm:$0xff] }
 0x617   : > { %v2690_v10 = vsel %vm674_vm1, %v2689_v9, 0.0 }
 0x618   : > { %2691 = vadd.xlane.f32.xlu0 %v2690_v10  ;;  %6002 = vmatpush3.bf16.msra.mxu1 %v6001_v20  ;;  %v6034_v10 = vpack.c.bf16 %v3057_v5, %v3056_v4 }
 0x619   : > { %6009 = vmatprep.subr.bf16.mxu1 %v6546_v0 }
 0x6a5   : > { %v2692_v11 = vpop.xlane.xlu0 %2691 }
 0x6a6   : > { %v2694_v12 = vmul.f32 0.03125, %v2692_v11  ;;  %v3054_v11 = vld [vmem:[#allocation5 + $0x250] sm:$0xff] }
 0x6a8   : > { %v2695_v13 = vsub.f32 %v2689_v9, %v2694_v12  ;;  %v6028_v9 = vpack.c.bf16 %v3053_v63, %v3052_v62  ;;  %v3055_v12 = vld [vmem:[#allocation5 + $0x258] sm:$0xff] }
 0x6aa   : > { %v2696_v14 = vmul.f32 %v2695_v13, %v2695_v13 }
 0x6ac   : > { %v2697_v3 = vsel %vm674_vm1, %v2696_v14, 0.0  ;;  %v3059_v14 = vld [vmem:[#allocation5 + $0x278] sm:$0xff] }
 0x6ad   : > { %2698 = vadd.xlane.f32.xlu1 %v2697_v3  ;;  %v6031_v3 = vpack.c.bf16 %v3055_v12, %v3054_v11  ;;  %v3374_v11 = vld [vmem:[#allocation5 + $0x288] sm:$0xff]  ;;  %v3377_v12 = vld [vmem:[#allocation5 + $0x2a0] sm:$0xff] }
 0x73a   : > { %v2699_v26 = vpop.xlane.xlu1 %2698 }
 0x73b   : > { %v2700_v23 = vmul.f32 0.03125, %v2699_v26 }
 0x73d   : > { %v2701_v24 = vadd.f32 1e-05, %v2700_v23  ;;  %v5270_v23 = vld [vmem:[#allocation7 + $0xd] ss:$0 sm:$0xff] }
 0x73f   : > { %6231 = vrsqrt.f32 %v2701_v24  ;;  %v5277_v24 = vld [vmem:[#allocation7 + $0x10] ss:$0 sm:$0xff] }
 0x749   : > { %v6232_v32 = vpop.eup %6231 }
 0x74a   : > { %v2703_v28 = vmul.f32 %v6232_v32, %v2695_v13  ;;  %v3058_v13 = vld [vmem:[#allocation5 + $0x270] sm:$0xff] }
 0x74b   : > { %v6037_v15 = vpack.c.bf16 %v3059_v14, %v3058_v13  ;;  %v3378_v14 = vld [vmem:[#allocation5 + $0x2a8] sm:$0xff] }
 0x74c   : > { %v2708_v40 = vmul.f32 %v2707_v31, %v2703_v28  ;;  %v5278_v31 = vld [vmem:[#allocation7 + $0x11] ss:$0 sm:$0xff] }
 0x74e   : > { %v7148_v44 = vadd.f32 %v2712_v37, %v2708_v40  ;;  %v5271_v40 = vld [vmem:[#allocation7 + $0xe] ss:$0 sm:$0xff] }
 0x750   : > { %5706 = vmatmul.mubr.msk.f32.vlgmr.msra.gmra.mrb[26].mxu0 %vm674_vm1, %v7148_v44  ;;  %5717 = vmatmul.mubr.msk.f32.vlgmr.msra.gmra.mrb[22].mxu1 %vm674_vm1, %v7148_v44 }
 0x751   : > { %6005 = vmatpush3.bf16.msra.mxu0 %v6004_v41  ;;  %6011 = vmatpush3.bf16.msra.mxu1 %v6010_v42 }
 0x752   : > { %6006 = vmatprep.subr.bf16.mxu0 %v6546_v0  ;;  %6012 = vmatprep.subr.bf16.mxu1 %v6546_v0 }
 0x753   : > { %5727 = vmatprep.mubr.msk.f32.mxu0 %vm6547_vm0, %v6548_v1  ;;  %5738 = vmatprep.mubr.msk.f32.mxu1 %vm6547_vm0, %v6548_v1 }
 0x755   : > { %6008 = vmatpush3.bf16.msra.mxu0 %v6007_v48  ;;  %6014 = vmatpush3.bf16.msra.mxu1 %v6013_v49  ;;  %v5279_v48 = vld [vmem:[#allocation7 + $0x12] ss:$0 sm:$0xff]  ;;  %v5280_v49 = vld [vmem:[#allocation7 + $0x13] ss:$0 sm:$0xff] }
 0x756   : > { %6015 = vmatprep.subr.bf16.mxu0 %v6546_v0  ;;  %6021 = vmatprep.subr.bf16.mxu1 %v6546_v0 }
 0x758   : > { %5728 = vmatmul.mubr.msk.f32.vlgmr.msra.gmra.mrb[28].mxu0 %vm674_vm1, %v7148_v44  ;;  %5739 = vmatmul.mubr.msk.f32.vlgmr.msra.gmra.mrb[24].mxu1 %vm674_vm1, %v7148_v44 }
 0x759   : > { %6017 = vmatpush3.bf16.msra.mxu0 %v6016_v54  ;;  %6023 = vmatpush3.bf16.msra.mxu1 %v6022_v55 }
 0x75a   : > { %6018 = vmatprep.subr.bf16.mxu0 %v6546_v0  ;;  %6024 = vmatprep.subr.bf16.mxu1 %v6546_v0 }
 0x75b   : > { %5749 = vmatprep.mubr.msk.f32.mxu0 %vm6547_vm0, %v6548_v1  ;;  %5760 = vmatprep.mubr.msk.f32.mxu1 %vm6547_vm0, %v6548_v1 }
 0x75d   : > { %6020 = vmatpush3.bf16.msra.mxu0 %v6019_v60  ;;  %6026 = vmatpush3.bf16.msra.mxu1 %v6025_v61 }
 0x75e   : > { %6027 = vmatprep.subr.bf16.mxu0 %v6546_v0  ;;  %6033 = vmatprep.subr.bf16.mxu1 %v6546_v0 }
 0x760   : > { %5750 = vmatmul.mubr.msk.f32.vlgmr.msra.gmra.mrb[30].mxu0 %vm674_vm1, %v7173_v8  ;;  %5761 = vmatmul.mubr.msk.f32.vlgmr.msra.gmra.mrb[26].mxu1 %vm674_vm1, %v7173_v8 }
 0x761   : > { %6029 = vmatpush3.bf16.msra.mxu0 %v6028_v9  ;;  %6035 = vmatpush3.bf16.msra.mxu1 %v6034_v10  ;;  %v3373_v10 = vld [vmem:[#allocation5 + $0x280] sm:$0xff] }
 0x762   : > { %6030 = vmatprep.subr.bf16.mxu0 %v6546_v0  ;;  %5771 = vmatprep.mubr.msk.f32.mxu0 %vm6547_vm0, %v6548_v1  ;;  %v6040_v13 = vpack.c.bf16 %v3374_v11, %v3373_v10 }
 0x763   : > { %6036 = vmatprep.subr.bf16.mxu1 %v6546_v0  ;;  %5782 = vmatprep.mubr.msk.f32.mxu1 %vm6547_vm0, %v6548_v1 }
 0x765   : > { %6032 = vmatpush3.bf16.msra.mxu0 %v6031_v3  ;;  %6038 = vmatpush3.bf16.msra.mxu1 %v6037_v15  ;;  %v6046_v3 = vpack.c.bf16 %v3378_v14, %v3377_v12  ;;  %v3375_v15 = vld [vmem:[#allocation5 + $0x290] sm:$0xff] }
 0x766   : > { %6039 = vmatprep.subr.bf16.mxu0 %v6546_v0  ;;  %6045 = vmatprep.subr.bf16.mxu1 %v6546_v0 }
 0x768   : > { %5772 = vmatmul.mubr.msk.f32.vlgmr.msra.gmra.mrb[32].mxu0 %vm674_vm1, %v7173_v8  ;;  %5783 = vmatmul.mubr.msk.f32.vlgmr.msra.gmra.mrb[28].mxu1 %vm674_vm1, %v7173_v8 }
 0x769   : > { %5793 = vmatprep.mubr.msk.f32.mxu0 %vm6547_vm0, %v6548_v1  ;;  %5804 = vmatprep.mubr.msk.f32.mxu1 %vm6547_vm0, %v6548_v1 }
 0x76a   : > { %6041 = vmatpush3.bf16.msra.mxu0 %v6040_v13  ;;  %6047 = vmatpush3.bf16.msra.mxu1 %v6046_v3 }
 0x76b   : > { %6042 = vmatprep.subr.bf16.mxu0 %v6546_v0  ;;  %6048 = vmatprep.subr.bf16.mxu1 %v6546_v0 }
 0x823   : > { %v2829_v2 = vpop.f32.mrb[26].mxu0  ;;  %v2899_v7 = vpop.f32.mrb[22].mxu1 }
 0x824   : > { %v7197_v17 = vadd.f32 %v5269_v16, %v2829_v2  ;;  %v5707_v19 = vpop.f32.mrb[27].mxu0  ;;  %v5718_v6 = vpop.f32.mrb[23].mxu1  ;;  %v7202_v28 = vadd.f32 %v5270_v23, %v2899_v7  ;;  %v3376_v16 = vld [vmem:[#allocation5 + $0x298] sm:$0xff]  ;;  %v3379_v2 = vld [vmem:[#allocation5 + $0x2b0] sm:$0xff] }
 0x825   : > { %v6043_v7 = vpack.c.bf16 %v3376_v16, %v3375_v15  ;;  %v3380_v19 = vld [vmem:[#allocation5 + $0x2b8] sm:$0xff]  ;;  %v3383_v23 = vld [vmem:[#allocation5 + $0x2d0] sm:$0xff] }
 0x826   : > { %v3698_v22 = vmul.f32 %v7197_v17, %v7197_v17  ;;  %v3699_v47 = vmul.f32 %v7202_v28, %v7202_v28  ;;  %v6049_v6 = vpack.c.bf16 %v3380_v19, %v3379_v2 }
 0x827   : > { %6044 = vmatpush3.bf16.msra.mxu0 %v6043_v7 }
 0x828   : > { %v3702_v18 = vsel %vm1614_vm2, %v3698_v22, 0.0  ;;  %v3705_v54 = vsel %vm1614_vm2, %v3699_v47, 0.0  ;;  %6050 = vmatpush3.bf16.msra.mxu1 %v6049_v6  ;;  %6051 = vmatprep.subr.bf16.mxu0 %v6546_v0  ;;  %v3381_v22 = vld [vmem:[#allocation5 + $0x2c0] sm:$0xff] }
 0x829   : > { %3703 = vadd.xlane.f32.xlu0 %v3702_v18  ;;  %v3382_v18 = vld [vmem:[#allocation5 + $0x2c8] sm:$0xff]  ;;  %6057 = vmatprep.subr.bf16.mxu1 %v6546_v0 }
 0x82a   : > { %5794 = vmatmul.mubr.msk.f32.vlgmr.msra.gmra.mrb[34].mxu0 %vm674_vm1, %v7173_v8 }
 0x82b   : > { %v2969_v27 = vpop.f32.mrb[28].mxu0  ;;  %v3039_v21 = vpop.f32.mrb[24].mxu1  ;;  %5805 = vmatmul.mubr.msk.f32.vlgmr.msra.gmra.mrb[30].mxu1 %vm674_vm1, %v7173_v8  ;;  %5815 = vmatprep.mubr.msk.f32.mxu0 %vm6547_vm0, %v6548_v1 }
 0x82c   : > { %v5729_v20 = vpop.f32.mrb[29].mxu0  ;;  %v5740_v26 = vpop.f32.mrb[25].mxu1  ;;  %v7212_v43 = vadd.f32 %v5271_v40, %v2969_v27  ;;  %v7229_v61 = vadd.f32 %v5272_v58, %v3039_v21  ;;  %v3385_v27 = vld [vmem:[#allocation5 + $0x2e0] sm:$0xff]  ;;  %v6052_v21 = vpack.c.bf16 %v3382_v18, %v3381_v22  ;;  %5826 = vmatprep.mubr.msk.f32.mxu1 %vm6547_vm0, %v6548_v1 }
 0x82d   : > { %v3386_v20 = vld [vmem:[#allocation5 + $0x2e8] sm:$0xff] }
 0x82e   : > { %v3700_v57 = vmul.f32 %v7212_v43, %v7212_v43  ;;  %v3701_v5 = vmul.f32 %v7229_v61, %v7229_v61  ;;  %v6058_v26 = vpack.c.bf16 %v3386_v20, %v3385_v27  ;;  %6053 = vmatpush3.bf16.msra.mxu0 %v6052_v21 }
 0x82f   : > { %6054 = vmatprep.subr.bf16.mxu0 %v6546_v0 }
 0x830   : > { %v3708_v62 = vsel %vm1614_vm2, %v3700_v57, 0.0  ;;  %v3711_v9 = vsel %vm1614_vm2, %v3701_v5, 0.0  ;;  %6059 = vmatpush3.bf16.msra.mxu1 %v6058_v26 }
 0x831   : > { %6060 = vmatprep.subr.bf16.mxu1 %v6546_v0 }
 0x833   : > { %v3158_v32 = vpop.f32.mrb[30].mxu0  ;;  %v3228_v33 = vpop.f32.mrb[26].mxu1 }
 0x834   : > { %v7204_v37 = vadd.f32 %v5277_v24, %v3158_v32  ;;  %v7206_v38 = vadd.f32 %v5278_v31, %v3228_v33  ;;  %v5751_v30 = vpop.f32.mrb[31].mxu0  ;;  %v5762_v39 = vpop.f32.mrb[27].mxu1  ;;  %v3384_v24 = vld [vmem:[#allocation5 + $0x2d8] sm:$0xff]  ;;  %v3387_v31 = vld [vmem:[#allocation5 + $0x2f0] sm:$0xff] }
 0x835   : > { %v6055_v32 = vpack.c.bf16 %v3384_v24, %v3383_v23  ;;  %v3388_v33 = vld [vmem:[#allocation5 + $0x2f8] sm:$0xff] }
 0x836   : > { %v3755_v41 = vmul.f32 %v7206_v38, %v7206_v38  ;;  %v3754_v42 = vmul.f32 %v7204_v37, %v7204_v37  ;;  %v6061_v30 = vpack.c.bf16 %v3388_v33, %v3387_v31 }
 0x837   : > { %6056 = vmatpush3.bf16.msra.mxu0 %v6055_v32 }
 0x838   : > { %v3761_v45 = vsel %vm1614_vm2, %v3755_v41, 0.0  ;;  %v3758_v46 = vsel %vm1614_vm2, %v3754_v42, 0.0  ;;  %6062 = vmatpush3.bf16.msra.mxu1 %v6061_v30  ;;  %5829 = vmatprep.subr.mxu0 %v6548_v1 }
 0x839   : > { %3762 = vadd.xlane.f32.xlu1 %v3761_v45  ;;  %3759 = vadd.xlane.f32.xlu0 %v3758_v46 }
 0x83a   : > { %5834 = vmatprep.subr.mxu1 %v6548_v1  ;;  %5816 = vmatmul.mubr.msk.f32.vlgmr.msra.gmra.mrb[36].mxu0 %vm674_vm1, %v7173_v8 }
 0x83b   : > { %v3298_v50 = vpop.f32.mrb[32].mxu0  ;;  %v3368_v51 = vpop.f32.mrb[28].mxu1  ;;  %5827 = vmatmul.mubr.msk.f32.vlgmr.msra.gmra.mrb[32].mxu1 %vm674_vm1, %v7173_v8  ;;  %5831 = vmatprep.mubr.msk.f32.mxu0 %vm6547_vm0, %v6548_v1 }
 0x83c   : > { %v7218_v52 = vadd.f32 %v5279_v48, %v3298_v50  ;;  %v5773_v53 = vpop.f32.mrb[33].mxu0  ;;  %v7221_v55 = vadd.f32 %v5280_v49, %v3368_v51  ;;  %v5784_v56 = vpop.f32.mrb[29].mxu1  ;;  %5836 = vmatprep.mubr.msk.f32.mxu1 %vm6547_vm0, %v6548_v1 }
 0x83d   : > { %3706 = vadd.xlane.f32.xlu0 %v3705_v54 }
 0x83e   : > { %v3756_v59 = vmul.f32 %v7218_v52, %v7218_v52  ;;  %v3757_v60 = vmul.f32 %v7221_v55, %v7221_v55 }
 0x840   : > { %v3764_v63 = vsel %vm1614_vm2, %v3756_v59, 0.0  ;;  %v3767_v4 = vsel %vm1614_vm2, %v3757_v60, 0.0 }
 0x841   : > { %3709 = vadd.xlane.f32.xlu0 %v3708_v62  ;;  %3765 = vadd.xlane.f32.xlu1 %v3764_v63 }
 0x845   : > { %3768 = vadd.xlane.f32.xlu1 %v3767_v4 }
 0x849   : > { %3712 = vadd.xlane.f32.xlu1 %v3711_v9 }
 0x8b6   : > { %v3704_v39 = vpop.xlane.xlu0 %3703 }
 0x8b7   : > { %6233 = vrsqrt.f32 %v3704_v39  ;;  %vm3716_vm8 = vcmp.eq.f32.partialorder %v3704_v39, inf  ;;  %v3719_v49 = vand.u32 2147483648, %v3704_v39  ;;  %vm3718_vm9 = vcmp.eq.f32.partialorder %v3704_v39, 0.0 }
 0x8c1   : > { %v6234_v42 = vpop.eup %6233 }
 0x8c2   : > { %v3715_v46 = vmul.f32 %v6234_v42, %v3704_v39 }
 0x8c4   : > { %v3717_v8 = vsel %vm3716_vm8, %v3704_v39, %v3715_v46 }
 0x8c5   : > { %v3720_v51 = vsel %vm3718_vm9, %v3719_v49, %v3717_v8 }
 0x8c6   : > { %v3763_v40 = vpop.xlane.xlu1 %3762  ;;  %v3760_v41 = vpop.xlane.xlu0 %3759  ;;  %v3742_v62 = vmax.f32 %v3720_v51, 1e-12 }
 0x8c7   : > { %6235 = vrsqrt.f32 %v3763_v40  ;;  %vm3779_vm10 = vcmp.eq.f32.partialorder %v3763_v40, inf  ;;  %v3782_v57 = vand.u32 2147483648, %v3763_v40  ;;  %vm3781_vm11 = vcmp.eq.f32.partialorder %v3763_v40, 0.0 }
 0x8c8   : > { %6237 = vrsqrt.f32 %v3760_v41  ;;  %vm3772_vm12 = vcmp.eq.f32.partialorder %v3760_v41, inf  ;;  %v3775_v4 = vand.u32 2147483648, %v3760_v41  ;;  %vm3774_vm13 = vcmp.eq.f32.partialorder %v3760_v41, 0.0 }
 0x8ca   : > { %v3707_v45 = vpop.xlane.xlu0 %3706 }
 0x8cb   : > { %6239 = vrsqrt.f32 %v3707_v45  ;;  %vm3723_vm14 = vcmp.eq.f32.partialorder %v3707_v45, inf  ;;  %v3726_v13 = vand.u32 2147483648, %v3707_v45  ;;  %vm3725_vm15 = vcmp.eq.f32.partialorder %v3707_v45, 0.0 }
 0x8ce   : > { %v3710_v47 = vpop.xlane.xlu0 %3709  ;;  %v3766_v48 = vpop.xlane.xlu1 %3765 }
 0x8cf   : > { %6241 = vrsqrt.f32 %v3710_v47  ;;  %vm3730_vm3 = vcmp.eq.f32.partialorder %v3710_v47, inf  ;;  %vm3732_vm4 = vcmp.eq.f32.partialorder %v3710_v47, 0.0  ;;  %v3733_v6 = vand.u32 2147483648, %v3710_v47 }
 0x8d0   : > { %6243 = vrsqrt.f32 %v3766_v48  ;;  %vm3786_vm5 = vcmp.eq.f32.partialorder %v3766_v48, inf  ;;  %v3789_v27 = vand.u32 2147483648, %v3766_v48  ;;  %vm3788_vm6 = vcmp.eq.f32.partialorder %v3766_v48, 0.0 }
 0x8d1   : > { %v6236_v50 = vpop.eup %6235 }
 0x8d2   : > { %v3778_v53 = vmul.f32 %v6236_v50, %v3763_v40  ;;  %v3769_v54 = vpop.xlane.xlu1 %3768  ;;  %v6238_v56 = vpop.eup %6237 }
 0x8d3   : > { %6245 = vrsqrt.f32 %v3769_v54  ;;  %v3771_v59 = vmul.f32 %v6238_v56, %v3760_v41  ;;  %vm3793_vm7 = vcmp.eq.f32.partialorder %v3769_v54, inf  ;;  %v3796_v33 = vand.u32 2147483648, %v3769_v54 }
 0x8d4   : > { %v3780_v58 = vsel %vm3779_vm10, %v3763_v40, %v3778_v53  ;;  %vm3795_vm8 = vcmp.eq.f32.partialorder %v3769_v54, 0.0 }
 0x8d5   : > { %v6240_v60 = vpop.eup %6239  ;;  %v3783_v63 = vsel %vm3781_vm11, %v3782_v57, %v3780_v58  ;;  %v3773_v9 = vsel %vm3772_vm12, %v3760_v41, %v3771_v59 }
 0x8d6   : > { %v3799_v5 = vmax.f32 %v3783_v63, 1e-12  ;;  %v3722_v10 = vmul.f32 %v6240_v60, %v3707_v45  ;;  %v3713_v11 = vpop.xlane.xlu1 %3712  ;;  %v3776_v12 = vsel %vm3774_vm13, %v3775_v4, %v3773_v9 }
 0x8d7   : > { %6247 = vrsqrt.f32 %v3713_v11  ;;  %v3798_v14 = vmax.f32 %v3776_v12, 1e-12  ;;  %vm3737_vm9 = vcmp.eq.f32.partialorder %v3713_v11, inf  ;;  %vm3739_vm10 = vcmp.eq.f32.partialorder %v3713_v11, 0.0 }
 0x8d8   : > { %6249 = vrcp.f32 %v3799_v5  ;;  %v3724_v3 = vsel %vm3723_vm14, %v3707_v45, %v3722_v10 }
 0x8d9   : > { %v6242_v15 = vpop.eup %6241  ;;  %6251 = vrcp.f32 %v3742_v62  ;;  %v3727_v16 = vsel %vm3725_vm15, %v3726_v13, %v3724_v3 }
 0x8da   : > { %v6244_v2 = vpop.eup %6243  ;;  %6253 = vrcp.f32 %v3798_v14  ;;  %v3743_v7 = vmax.f32 %v3727_v16, 1e-12  ;;  %v3729_v19 = vmul.f32 %v6242_v15, %v3710_v47  ;;  %v627_v14 = vld [vmem:[%s623_s13] sm:$0x1]  ;;  %s5322_s13 = sshll.u32 %s6655_s24, 9 }
 0x8db   : > { %v3785_v22 = vmul.f32 %v6244_v2, %v3766_v48  ;;  %vm4118_vm11 = vcmp.eq.s32.totalorder %v627_v14, 0  ;;  %v4469_v2 = vld [vmem:[#allocation8 + $0x38] sm:$0xff] }
 0x8dc   : > { %6255 = vrcp.f32 %v3743_v7  ;;  %v3731_v18 = vsel %vm3730_vm3, %v3710_v47, %v3729_v19  ;;  %v3740_v47 = vand.u32 2147483648, %v3713_v11  ;;  %v4119_v3 = vsel %vm4118_vm11, 1, %v6549_v36 }
 0x8dd   : > { %v6246_v21 = vpop.eup %6245  ;;  %v3734_v20 = vsel %vm3732_vm4, %v3733_v6, %v3731_v18  ;;  %v3787_v26 = vsel %vm3786_vm5, %v3766_v48, %v3785_v22  ;;  %v4123_v15 = vrot.slane %v4119_v3, %v7064_v35 }
 0x8de   : > { %v3744_v23 = vmax.f32 %v3734_v20, 1e-12  ;;  %v3790_v24 = vsel %vm3788_vm6, %v3789_v27, %v3787_v26  ;;  %v3792_v31 = vmul.f32 %v6246_v21, %v3769_v54 }
 0x8df   : > { %v3800_v32 = vmax.f32 %v3790_v24, 1e-12  ;;  %vm7301_vm12 = vcmp.eq.s32.totalorder %v4123_v15, 1  ;;  %v4466_v15 = vld [vmem:[#allocation8 + $0x20] sm:$0xff] }
 0x8e0   : > { %v3794_v30 = vsel %vm3793_vm7, %v3769_v54, %v3792_v31 }
 0x8e1   : > { %v6248_v39 = vpop.eup %6247  ;;  %6257 = vrcp.f32 %v3800_v32  ;;  %v3797_v40 = vsel %vm3795_vm8, %v3796_v33, %v3794_v30 }
 0x8e2   : > { %v6250_v41 = vpop.eup %6249  ;;  %6259 = vrcp.f32 %v3744_v23  ;;  %v3801_v42 = vmax.f32 %v3797_v40, 1e-12  ;;  %v3736_v45 = vmul.f32 %v6248_v39, %v3713_v11 }
 0x8e3   : > { %v6252_v46 = vpop.eup %6251  ;;  %v3807_v48 = vmul.f32 %v6250_v41, %v7206_v38 }
 0x8e4   : > { %v6254_v8 = vpop.eup %6253  ;;  %6261 = vrcp.f32 %v3801_v42  ;;  %v3738_v49 = vsel %vm3737_vm9, %v3713_v11, %v3736_v45  ;;  %v3750_v38 = vmul.f32 %v6252_v46, %v7197_v17 }
 0x8e5   : > { %v3741_v50 = vsel %vm3739_vm10, %v3740_v47, %v3738_v49  ;;  %v3806_v51 = vmul.f32 %v6254_v8, %v7204_v37  ;;  %5835 = vmatpush3.xpose.msk.msra.mxu1 %vm1614_vm2, %v3807_v48 }
 0x8e6   : > { %v6256_v53 = vpop.eup %6255  ;;  %v3745_v54 = vmax.f32 %v3741_v50, 1e-12  ;;  %5844 = vmatprep.subr.mxu1 %v6548_v1 }
 0x8e7   : > { %5830 = vmatpush3.xpose.msk.msra.mxu0 %vm1614_vm2, %v3806_v51  ;;  %v3751_v56 = vmul.f32 %v6256_v53, %v7202_v28 }
 0x8e8   : > { %6263 = vrcp.f32 %v3745_v54  ;;  %5839 = vmatprep.subr.mxu0 %v6548_v1 }
 0x8e9   : > { %5837 = vmatmul.mubr.msk.f32.vlgmr.msra.gmra.mrb[34].mxu1 %vm1614_vm2, %v3751_v56 }
 0x8ea   : > { %5832 = vmatmul.mubr.msk.f32.vlgmr.msra.gmra.mrb[38].mxu0 %vm1614_vm2, %v3750_v38  ;;  %5846 = vmatprep.mubr.msk.f32.mxu1 %vm6547_vm0, %v6548_v1 }
 0x8eb   : > { %v6258_v37 = vpop.eup %6257  ;;  %5841 = vmatprep.mubr.msk.f32.mxu0 %vm6547_vm0, %v6548_v1 }
 0x8ec   : > { %v6260_v57 = vpop.eup %6259  ;;  %v3808_v58 = vmul.f32 %v6258_v37, %v7218_v52 }
 0x8ed   : > { %v3752_v17 = vmul.f32 %v6260_v57, %v7212_v43  ;;  %v5285_v43 = vld [vmem:[#allocation7 + $0x14] ss:$0 sm:$0xff] }
 0x8ee   : > { %v6262_v28 = vpop.eup %6261  ;;  %5840 = vmatpush3.xpose.msk.msra.mxu0 %vm1614_vm2, %v3808_v58 }
 0x8ef   : > { %v3809_v59 = vmul.f32 %v6262_v28, %v7221_v55  ;;  %5849 = vmatprep.subr.mxu0 %v6548_v1  ;;  %v5286_v55 = vld [vmem:[#allocation7 + $0x15] ss:$0 sm:$0xff] }
 0x8f1   : > { %5842 = vmatmul.mubr.msk.f32.vlgmr.msra.gmra.mrb[40].mxu0 %vm1614_vm2, %v3752_v17  ;;  %5845 = vmatpush3.xpose.msk.msra.mxu1 %vm1614_vm2, %v3809_v59 }
 0x8f2   : > { %v6264_v60 = vpop.eup %6263  ;;  %5854 = vmatprep.subr.mxu1 %v6548_v1  ;;  %5851 = vmatprep.mubr.msk.f32.mxu0 %vm6547_vm0, %v6548_v1 }
 0x8f3   : > { %v3753_v52 = vmul.f32 %v6264_v60, %v7229_v61 }
 0x8f5   : > { %5847 = vmatmul.mubr.msk.f32.vlgmr.msra.gmra.mrb[36].mxu1 %vm1614_vm2, %v3753_v52 }
 0x8f6   : > { %5856 = vmatprep.mubr.msk.f32.mxu1 %vm6547_vm0, %v6548_v1 }
 0x8fd   : > { %v3484_v62 = vpop.f32.mrb[34].mxu0 }
 0x8fe   : > { %v3485_v63 = vadd.f32 %v5285_v43, %v3484_v62  ;;  %v5795_v4 = vpop.f32.mrb[35].mxu0  ;;  %v3554_v5 = vpop.f32.mrb[30].mxu1 }
 0x8ff   : > { %v3555_v9 = vadd.f32 %v5286_v55, %v3554_v5  ;;  %v5806_v10 = vpop.f32.mrb[31].mxu1  ;;  %v5288_v55 = vld [vmem:[#allocation7 + $0x17] ss:$0 sm:$0xff] }
 0x900   : > { %5850 = vmatpush3.msra.mxu0 %v3485_v63  ;;  %v5287_v63 = vld [vmem:[#allocation7 + $0x16] ss:$0 sm:$0xff] }
 0x901   : > { %5855 = vmatpush3.msra.mxu1 %v3555_v9  ;;  %5859 = vmatprep.subr.mxu0 %v6548_v1 }
 0x902   : > { %5864 = vmatprep.subr.mxu1 %v6548_v1 }
 0x90d   : > { %v7291_v61 = vpop.f32.mrb[36].mxu0 }
 0x90e   : > { %v5817_v11 = vpop.f32.mrb[37].mxu0  ;;  %v7293_v12 = vpop.f32.mrb[32].mxu1 }
 0x90f   : > { %v5828_v13 = vpop.f32.mrb[33].mxu1  ;;  %v3695_v10 = vadd.f32 %v5288_v55, %v7293_v12 }
 0x910   : > { %v3625_v13 = vadd.f32 %v5287_v63, %v7291_v61  ;;  %v4892_v63 = vld [vmem:[#allocation10 + $0x28] sm:$0xff] }
 0x9bc   : > { %v3958_v16 = vpop.f32.mrb[34].mxu1 }
 0x9bd   : > { %v3882_v7 = vpop.f32.mrb[38].mxu0  ;;  %v4115_v19 = vmul.f32 13.273212, %v3958_v16  ;;  %v5838_v6 = vpop.f32.mrb[35].mxu1  ;;  %v4467_v16 = vld [vmem:[#allocation8 + $0x28] sm:$0xff] }
 0x9be   : > { %v4114_v22 = vmul.f32 13.273212, %v3882_v7  ;;  %v5833_v18 = vpop.f32.mrb[39].mxu0 }
 0x9bf   : > { %v4126_v27 = vsel %vm7301_vm12, -1e+18, %v4115_v19  ;;  %v4468_v19 = vld [vmem:[#allocation8 + $0x30] sm:$0xff] }
 0x9c0   : > { %v4125_v21 = vsel %vm7301_vm12, -1e+18, %v4114_v22  ;;  %v4132_v36 = vsel %vm1614_vm2, %v4126_v27, -inf }
 0x9c1   : > { %v4129_v35 = vsel %vm1614_vm2, %v4125_v21, -inf  ;;  %4133 = vmax.xlane.f32.xlu1 %v4132_v36 }
 0x9c2   : > { %4130 = vmax.xlane.f32.xlu0 %v4129_v35 }
 0x9c4   : > { %v4034_v20 = vpop.f32.mrb[40].mxu0 }
 0x9c5   : > { %v4116_v26 = vmul.f32 13.273212, %v4034_v20  ;;  %v5843_v23 = vpop.f32.mrb[41].mxu0 }
 0x9c7   : > { %v4127_v24 = vsel %vm7301_vm12, -1e+18, %v4116_v26 }
 0x9c8   : > { %v4110_v31 = vpop.f32.mrb[36].mxu1  ;;  %v4135_v32 = vsel %vm1614_vm2, %v4127_v24, -inf }
 0x9c9   : > { %v4117_v33 = vmul.f32 13.273212, %v4110_v31  ;;  %4136 = vmax.xlane.f32.xlu0 %v4135_v32  ;;  %v5848_v30 = vpop.f32.mrb[37].mxu1 }
 0x9cb   : > { %v4128_v39 = vsel %vm7301_vm12, -1e+18, %v4117_v33 }
 0x9cc   : > { %v4138_v40 = vsel %vm1614_vm2, %v4128_v39, -inf }
 0x9cd   : > { %4139 = vmax.xlane.f32.xlu1 %v4138_v40 }
 0xa4e   : > { %v4134_v41 = vpop.xlane.xlu1 %4133 }
 0xa4f   : > { %v4131_v42 = vpop.xlane.xlu0 %4130  ;;  %v4142_v45 = vsub.f32 %v4126_v27, %v4134_v41 }
 0xa50   : > { %v4141_v46 = vsub.f32 %v4125_v21, %v4131_v42 }
 0xa51   : > { %v4147_v47 = vmul.f32 1.442695, %v4142_v45 }
 0xa52   : > { %v4145_v48 = vmul.f32 1.442695, %v4141_v46 }
 0xa53   : > { %6265 = vpow2.f32 %v4147_v47 }
 0xa54   : > { %6267 = vpow2.f32 %v4145_v48 }
 0xa56   : > { %v4137_v8 = vpop.xlane.xlu0 %4136 }
 0xa57   : > { %v4143_v49 = vsub.f32 %v4127_v24, %v4137_v8 }
 0xa59   : > { %v4149_v50 = vmul.f32 1.442695, %v4143_v49 }
 0xa5a   : > { %v4140_v51 = vpop.xlane.xlu1 %4139 }
 0xa5b   : > { %6269 = vpow2.f32 %v4149_v50  ;;  %v4144_v53 = vsub.f32 %v4128_v39, %v4140_v51 }
 0xa5d   : > { %v6266_v54 = vpop.eup %6265  ;;  %v4151_v56 = vmul.f32 1.442695, %v4144_v53 }
 0xa5e   : > { %v6268_v38 = vpop.eup %6267  ;;  %v4156_v37 = vsel %vm1614_vm2, %v6266_v54, 0.0 }
 0xa5f   : > { %6271 = vpow2.f32 %v4151_v56  ;;  %v4153_v57 = vsel %vm1614_vm2, %v6268_v38, 0.0  ;;  %4157 = vadd.xlane.f32.xlu1 %v4156_v37  ;;  %v4803_v37 = vld [vmem:[%s7552_s28 + $0x8] sm:$0xff] }
 0xa60   : > { %4154 = vadd.xlane.f32.xlu0 %v4153_v57 }
 0xa65   : > { %v6270_v58 = vpop.eup %6269 }
 0xa66   : > { %v4159_v28 = vsel %vm1614_vm2, %v6270_v58, 0.0 }
 0xa67   : > { %4160 = vadd.xlane.f32.xlu0 %v4159_v28 }
 0xa69   : > { %v6272_v17 = vpop.eup %6271 }
 0xa6a   : > { %v4162_v59 = vsel %vm1614_vm2, %v6272_v17, 0.0 }
 0xa6b   : > { %4163 = vadd.xlane.f32.xlu1 %v4162_v59  ;;  %v4888_v59 = vld [vmem:[#allocation10 + $0x8] sm:$0xff] }
 0xaec   : > { %v4158_v60 = vpop.xlane.xlu1 %4157 }
 0xaed   : > { %v4155_v52 = vpop.xlane.xlu0 %4154  ;;  %6273 = vrcp.f32 %v4158_v60  ;;  %v4889_v60 = vld [vmem:[#allocation10 + $0x10] sm:$0xff] }
 0xaee   : > { %6275 = vrcp.f32 %v4155_v52 }
 0xaf4   : > { %v4161_v43 = vpop.xlane.xlu0 %4160 }
 0xaf5   : > { %6277 = vrcp.f32 %v4161_v43  ;;  %v4890_v43 = vld [vmem:[#allocation10 + $0x18] sm:$0xff] }
 0xaf6   : > { %v6073_v55 = vpack.c.bf16 %v4890_v43, %v4889_v60 }
 0xaf7   : > { %v6274_v62 = vpop.eup %6273 }
 0xaf8   : > { %v6276_v4 = vpop.eup %6275  ;;  %v4170_v5 = vmul.f32 %v6274_v62, %v6266_v54  ;;  %v4164_v9 = vpop.xlane.xlu1 %4163  ;;  %v4891_v62 = vld [vmem:[#allocation10 + $0x20] sm:$0xff] }
 0xaf9   : > { %v4169_v11 = vmul.f32 %v6276_v4, %v6268_v38  ;;  %6279 = vrcp.f32 %v4164_v9  ;;  %v4802_v38 = vld [vmem:[%s7552_s28] sm:$0xff]  ;;  %v6076_v4 = vpack.c.bf16 %v4892_v63, %v4891_v62 }
 0xafa   : > { %5002 = vst.msk [vmem:[%s7324_s27 + $0x8] sm:$0xff] %vm1614_vm2, %v4170_v5  ;;  %5857 = vmatmul.mubr.msk.f32.vlgmr.msra.gmra.mrb[38].mxu1 %vm1614_vm2, %v4170_v5  ;;  %v6064_v57 = vpack.c.bf16 %v4803_v37, %v4802_v38 }
 0xafb   : > { %5001 = vst.msk [vmem:[%s7324_s27] sm:$0xff] %vm1614_vm2, %v4169_v11  ;;  %5852 = vmatmul.mubr.msk.f32.vlgmr.msra.gmra.mrb[42].mxu0 %vm1614_vm2, %v4169_v11  ;;  %5865 = vmatpush3.msra.mxu1 %v3695_v10  ;;  %v4794_v11 = vsub.s32 1, %v7061_v34 }
 0xafc   : > { %5860 = vmatpush3.msra.mxu0 %v3625_v13  ;;  %5861 = vmatprep.mubr.msk.f32.mxu0 %vm6547_vm0, %v6548_v1 }
 0xafd   : > { %5866 = vmatprep.mubr.msk.f32.mxu1 %vm6547_vm0, %v6548_v1  ;;  %5869 = vmatprep.subr.mxu0 %v6548_v1  ;;  %v4795_v13 = vrot.slane %v7137_v25, %v4794_v11 }
 0xafe   : > { %5874 = vmatprep.subr.mxu1 %v6548_v1 }
 0xaff   : > { %v6278_v61 = vpop.eup %6277 }
 0xb00   : > { %v4171_v12 = vmul.f32 %v6278_v61, %v6270_v58  ;;  %v4805_v58 = vld [vmem:[%s7552_s28 + $0x18] sm:$0xff] }
 0xb02   : > { %5003 = vst.msk [vmem:[%s7324_s27 + $0x10] sm:$0xff] %vm1614_vm2, %v4171_v12  ;;  %5862 = vmatmul.mubr.msk.f32.vlgmr.msra.gmra.mrb[44].mxu0 %vm1614_vm2, %v4171_v12 }
 0xb03   : > { %v6280_v14 = vpop.eup %6279  ;;  %5871 = vmatprep.mubr.msk.f32.mxu0 %vm6547_vm0, %v6548_v1  ;;  %5870 = vmatpush3.msra.mxu0 %v4466_v15 }
 0xb04   : > { %v4172_v3 = vmul.f32 %v6280_v14, %v6272_v17  ;;  %5879 = vmatprep.subr.mxu0 %v6548_v1  ;;  %v4887_v17 = vld [vmem:[#allocation10] sm:$0xff]  ;;  %v4800_v14 = vrot.slane %v7142_v29, %v4794_v11  ;;  %v5313_v29 = vld [vmem:[%s7554_s22] ss:$0 sm:$0xff]  ;;  %s6550_s22 = smov [#allocation12]  }
 0xb05   : > { %v6070_v52 = vpack.c.bf16 %v4888_v59, %v4887_v17  ;;  %s6433_s23 = sshll.u32 %s6550_s22, 4  ;;  %s6434_s23 = int_to_ptr.vmem [resolvable:$false] %s6433_s23 }
 0xb06   : > { %5004 = vst.msk [vmem:[%s7324_s27 + $0x18] sm:$0xff] %vm1614_vm2, %v4172_v3  ;;  %5867 = vmatmul.mubr.msk.f32.vlgmr.msra.gmra.mrb[40].mxu1 %vm1614_vm2, %v4172_v3  ;;  %s6435_s27 = scalar_lea.vmem %s6434_s23, 1024  ;;  %p6436_p3 = scmp.lt.s32.totalorder %s7409_s25, %s6434_s23 }
 0xb07   : > { %5876 = vmatprep.mubr.msk.f32.mxu1 %vm6547_vm0, %v6548_v1  ;;  %5875 = vmatpush3.msra.mxu1 %v4467_v16  ;;  %v4893_v16 = vld [vmem:[#allocation10 + $0x30] sm:$0xff]  ;;  %p6437_p13 = scmp.lt.s32.totalorder %s6435_s27, %s6429_s10 }
 0xb08   : > { %5884 = vmatprep.subr.mxu1 %v6548_v1 }
 0xb09   : > { %p6438_p0 = por %p6437_p13, %p6436_p3 }
 0xb0b   : > { %p6439_p2 = pnand %p6438_p0, %p6432_p12 }
 0xbcd   : > { %v4315_v7 = vpop.f32.mrb[38].mxu1 }
 0xbce   : > { %v4242_v6 = vpop.f32.mrb[42].mxu0  ;;  %v5858_v22 = vpop.f32.mrb[39].mxu1  ;;  %5877 = vmatmul.mubr.msk.f32.vlgmr.msra.gmra.mrb[42].mxu1 %vm1614_vm2, %v4315_v7 }
 0xbcf   : > { %v5853_v18 = vpop.f32.mrb[43].mxu0  ;;  %5872 = vmatmul.mubr.msk.f32.vlgmr.msra.gmra.mrb[46].mxu0 %vm1614_vm2, %v4242_v6  ;;  %5885 = vmatpush3.msra.mxu1 %v4469_v2  ;;  %v4894_v2 = vld [vmem:[#allocation10 + $0x38] sm:$0xff] }
 0xbd0   : > { %5880 = vmatpush3.msra.mxu0 %v4468_v19  ;;  %5881 = vmatprep.mubr.msk.f32.mxu0 %vm6547_vm0, %v6548_v1  ;;  %v6079_v7 = vpack.c.bf16 %v4894_v2, %v4893_v16 }
 0xbd1   : > { %5886 = vmatprep.mubr.msk.f32.mxu1 %vm6547_vm0, %v6548_v1  ;;  %6063 = vmatprep.subr.bf16.mxu0 %v6546_v0 }
 0xbd2   : > { %6069 = vmatprep.subr.bf16.mxu1 %v6546_v0 }
 0xbd5   : > { %v4388_v27 = vpop.f32.mrb[44].mxu0 }
 0xbd6   : > { %v5863_v21 = vpop.f32.mrb[45].mxu0  ;;  %5882 = vmatmul.mubr.msk.f32.vlgmr.msra.gmra.mrb[48].mxu0 %vm1614_vm2, %v4388_v27 }
 0xbd7   : > { %5897 = vmatprep.mubr.msk.f32.mxu0 %vm6547_vm0, %v6548_v1  ;;  %6065 = vmatpush3.bf16.msra.mxu0 %v6064_v57 }
 0xbd8   : > { %6066 = vmatprep.subr.bf16.mxu0 %v6546_v0 }
 0xbd9   : > { %v4461_v36 = vpop.f32.mrb[40].mxu1 }
 0xbda   : > { %v5868_v35 = vpop.f32.mrb[41].mxu1  ;;  %5887 = vmatmul.mubr.msk.f32.vlgmr.msra.gmra.mrb[44].mxu1 %vm1614_vm2, %v4461_v36 }
 0xbdb   : > { %5916 = vmatprep.mubr.msk.f32.mxu1 %vm6547_vm0, %v6548_v1  ;;  %v5310_v1 = vld [vmem:[%s7500_s7 + $0x1] ss:$0 sm:$0xff]  ;;  %6071 = vmatpush3.bf16.msra.mxu1 %v6070_v52  ;;  %vm4902_vm0 = vcmask 523264  }
 0xbdc   : > { %6072 = vmatprep.subr.bf16.mxu1 %v6546_v0 }
 0xbdf   : > { %6074 = vmatpush3.bf16.msra.mxu1 %v6073_v55 }
 0xbe0   : > { %6075 = vmatprep.subr.bf16.mxu1 %v6546_v0 }
 0xbe3   : > { %6077 = vmatpush3.bf16.msra.mxu1 %v6076_v4 }
 0xbe4   : > { %6078 = vmatprep.subr.bf16.mxu1 %v6546_v0  ;;  %v5311_v0 = vld [vmem:[%s7553_s15] ss:$0 sm:$0xff]  ;;  %s7407_s15 = scalar_lea.hbm %s7555_s16, %s5322_s13 }
 0xbe7   : > { %6080 = vmatpush3.bf16.msra.mxu1 %v6079_v7 }
 0xca1   : > { %v4612_v20 = vpop.f32.mrb[42].mxu1 }
 0xca2   : > { %v4539_v26 = vpop.f32.mrb[46].mxu0  ;;  %v4763_v23 = vsel %vm674_vm1, %v4612_v20, 0.0  ;;  %v5878_v24 = vpop.f32.mrb[43].mxu1 }
 0xca3   : > { %v4762_v31 = vsel %vm674_vm1, %v4539_v26, 0.0  ;;  %v5873_v32 = vpop.f32.mrb[47].mxu0 }
 0xca4   : > { %v4764_v33 = vadd.f32 %v4763_v23, %v4762_v31 }
 0xca9   : > { %v4685_v30 = vpop.f32.mrb[48].mxu0 }
 0xcaa   : > { %v4765_v39 = vsel %vm674_vm1, %v4685_v30, 0.0  ;;  %v5883_v40 = vpop.f32.mrb[49].mxu0 }
 0xcab   : > { %v4766_v41 = vadd.f32 %v4765_v39, %v4764_v33 }
 0xcad   : > { %v4758_v42 = vpop.f32.mrb[44].mxu1 }
 0xcae   : > { %v4767_v45 = vsel %vm674_vm1, %v4758_v42, 0.0  ;;  %v5888_v46 = vpop.f32.mrb[45].mxu1 }
 0xcaf   : > { %v4768_v47 = vadd.f32 %v4767_v45, %v4766_v41 }
 0xcb1   : > { %v4777_v48 = vadd.f32 %v5310_v1, %v4768_v47 }
 0xcb3   : > { %v4778_v8 = vadd.f32 %v4777_v48, %v7148_v44  ;;  %v4804_v44 = vld [vmem:[%s7552_s28 + $0x10] sm:$0xff] }
 0xcb4   : > { %v6067_v28 = vpack.c.bf16 %v4805_v58, %v4804_v44 }
 0xcb5   : > { %v4779_v49 = vsel %vm674_vm1, %v4778_v8, 0.0 }
 0xcb6   : > { %4780 = vadd.xlane.f32.xlu0 %v4779_v49  ;;  %6068 = vmatpush3.bf16.msra.mxu0 %v6067_v28 }
 0xd43   : > { %v4781_v50 = vpop.xlane.xlu0 %4780 }
 0xd44   : > { %v4782_v51 = vmul.f32 0.03125, %v4781_v50 }
 0xd46   : > { %v4783_v53 = vsub.f32 %v4778_v8, %v4782_v51 }
 0xd48   : > { %v4784_v54 = vmul.f32 %v4783_v53, %v4783_v53 }
 0xd4a   : > { %v4785_v56 = vsel %vm674_vm1, %v4784_v54, 0.0 }
 0xd4b   : > { %4786 = vadd.xlane.f32.xlu1 %v4785_v56 }
 0xdd8   : > { %v4787_v5 = vpop.xlane.xlu1 %4786 }
 0xdd9   : > { %v4788_v9 = vmul.f32 0.03125, %v4787_v5 }
 0xddb   : > { %v4789_v10 = vadd.f32 1e-05, %v4788_v9 }
 0xddd   : > { %6281 = vrsqrt.f32 %v4789_v10 }
 0xde7   : > { %v6282_v61 = vpop.eup %6281 }
 0xde8   : > { %v4791_v12 = vmul.f32 %v6282_v61, %v4783_v53 }
 0xdea   : > { %v4796_v3 = vmul.f32 %v4795_v13, %v4791_v12 }
 0xdec   : > { %v4801_v15 = vadd.f32 %v4800_v14, %v4796_v3 }
 0xdee   : > { %5898 = vmatmul.mubr.msk.f32.vlgmr.msra.gmra.mrb[50].mxu0 %vm674_vm1, %v4801_v15 }
 0xec1   : > { %v4882_v19 = vpop.f32.mrb[50].mxu0 }
 0xec2   : > { %v4883_v6 = vadd.f32 %v5311_v0, %v4882_v19  ;;  %v5899_v22 = vpop.f32.mrb[51].mxu0 }
 0xec4   : > { %v4886_v25 = vmax.f32 %v4883_v6, 0.0 }
 0xec6   : > { %5917 = vmatmul.mubr.msk.f32.vlgmr.msra.gmra.mrb[46].mxu1 %vm4902_vm0, %v4886_v25 }
 0xf99   : > { %v4972_v18 = vpop.f32.mrb[46].mxu1 }
 0xf9a   : > { %v4973_v27 = vadd.f32 %v5313_v29, %v4972_v18  ;;  %v5918_v21 = vpop.f32.mrb[47].mxu1 }
 0xf9c   : > { %v4976_v36 = vadd.f32 %v4973_v27, %v4801_v15 }
 0xf9e   : > { %v4977_v35 = vsel %vm674_vm1, %v4976_v36, 0.0 }
 0xf9f   : > { %4978 = vadd.xlane.f32.xlu0 %v4977_v35 }
0x102c   : > { %v4979_v20 = vpop.xlane.xlu0 %4978 }
0x102d   : > { %v4980_v26 = vmul.f32 0.03125, %v4979_v20 }
0x102f   : > { %v4981_v23 = vsub.f32 %v4976_v36, %v4980_v26 }
0x1031   : > { %v4982_v24 = vmul.f32 %v4981_v23, %v4981_v23 }
0x1033   : > { %v4983_v31 = vsel %vm674_vm1, %v4982_v24, 0.0 }
0x1034   : > { %4984 = vadd.xlane.f32.xlu1 %v4983_v31 }
0x1035   : > { %6442 = shalt.err (!%p6439_p2)
}
0x1036   : > { %s6443_s13 = scalar_lea.hbm %s7407_s15, 512  ;;  %s6447_s22 = scalar_lea.hbm %s7555_s16, 1024 }
0x1037   : > { %p6444_p8 = scmp.ne.s32.totalorder %s7407_s15, %s6443_s13  ;;  %p6448_p11 = scmp.lt.u32.totalorder %s7407_s15, %s7555_s16 }
0x1038   : > { %p6449_p1 = scmp.lt.u32.totalorder %s6447_s22, %s6443_s13  ;;  %p6451_p6 = scmp.lt.u32.totalorder %s6443_s13, %s7407_s15 }
0x1039   : > { %p6445_p4 = pnand %p6444_p8, %p7556_p7 }
0x103a   : > { %p6450_p5 = por %p6449_p1, %p6448_p11 }
0x103b   : > { %p6446_p10 = pneg %p6445_p4 }
0x103c   : > { %p6452_p9 = por %p6451_p6, %p6450_p5 }
0x103e   : > { %p6453_p12 = pnand %p6452_p9, %p6446_p10 }
0x1040   : > { %6456 = shalt.err (!%p6453_p12)
}
0x1041   : > { %s6551_s10 = smov 128   ;;  %s6552_s27 = smov 8   ;;  %v4992_v39 = vsub.s32 2, %v7061_v34  ;;  %v6285_v40 = vld [vmem:[%s7501_s8] sm:$0x7] }
0x1042   : > { %s7557_s30 = scalar_lea.sflag [#allocation13], %s6859_s4  ;;  %v6286_v1 = vld [vmem:[%s7548_s9] sm:$0x7]  ;;  %s7559_s0 = sld [smem:[#allocation26_spill]] }
0x1043   : > { %6100 = dma.vmem_to_hbm [thread:$0]  (%p7556_p7), %s7409_s25, 512, %s7407_s15, %s7557_s30, %s6551_s10, %s6551_s10, %s6552_s27   ;;  %v4993_v41 = vrot.slane %v6285_v40, %v4992_v39  ;;  %v4998_v46 = vrot.slane %v6286_v1, %v4992_v39 }
0x1044   : > { %s5317_s25 = sshll.u32 %s6655_s24, 7  ;;  %s7558_s15 = sshll.u32 %s6859_s4, 3 }
0x1045   : > { %s606_s23 = scalar_lea.vmem [#allocation11], %s7558_s15  ;;  %s5006_s13 = scalar_lea.sflag [#allocation4], %s6859_s4 }
0x1046   : > { %s5024_s10 = sshll.u32 %s606_s23, 4  ;;  %s6553_s24 = smov [#allocation11]   ;;  %s7450_s10 = int_to_ptr.vmem [resolvable:$true] %s5024_s10 }
0x1047   : > { %s6457_s17 = scalar_lea.vmem %s7450_s10, 128  ;;  %s6461_s22 = sshll.u32 %s6553_s24, 4  ;;  %s6462_s22 = int_to_ptr.vmem [resolvable:$false] %s6461_s22 }
0x1048   : > { %s7448_s3 = scalar_lea.hbm %s7559_s0, %s5317_s25  ;;  %p6458_p3 = scmp.ne.s32.totalorder %s7450_s10, %s6457_s17 }
0x1049   : > { %s6463_s15 = scalar_lea.vmem %s6462_s22, 256  ;;  %p6464_p2 = scmp.lt.s32.totalorder %s7450_s10, %s6462_s22 }
0x104a   : > { %p6459_p13 = pnand %p6458_p3, %p7556_p7  ;;  %p6465_p8 = scmp.lt.s32.totalorder %s6463_s15, %s6457_s17 }
0x104c   : > { %p6460_p0 = pneg %p6459_p13  ;;  %p6466_p4 = por %p6465_p8, %p6464_p2 }
0x104e   : > { %p6467_p10 = pnand %p6466_p4, %p6460_p0 }
0x10c1   : > { %v4985_v32 = vpop.xlane.xlu1 %4984 }
0x10c2   : > { %v4986_v33 = vmul.f32 0.03125, %v4985_v32 }
0x10c4   : > { %v4987_v30 = vadd.f32 1e-05, %v4986_v33 }
0x10c6   : > { %6283 = vrsqrt.f32 %v4987_v30 }
0x10d0   : > { %v6284_v42 = vpop.eup %6283 }
0x10d1   : > { %v4989_v45 = vmul.f32 %v6284_v42, %v4981_v23 }
0x10d3   : > { %v4994_v47 = vmul.f32 %v4993_v41, %v4989_v45 }
0x10d5   : > { %v4999_v48 = vadd.f32 %v4998_v46, %v4994_v47 }
0x10d7   : > { %5000 = vst.msk [vmem:[%s606_s23] sm:$0xff] %vm674_vm1, %v4999_v48 }
0x10d8   : > { %6470 = shalt.err (!%p6467_p10)
}
0x10d9   : > { %s6471_s4 = scalar_lea.hbm %s7448_s3, 128  ;;  %s6475_s27 = scalar_lea.hbm %s7559_s0, 256 }
0x10da   : > { %p6472_p11 = scmp.ne.s32.totalorder %s7448_s3, %s6471_s4  ;;  %p6476_p6 = scmp.lt.u32.totalorder %s7448_s3, %s7559_s0 }
0x10db   : > { %p6477_p9 = scmp.lt.u32.totalorder %s6475_s27, %s6471_s4  ;;  %p6479_p3 = scmp.lt.u32.totalorder %s6471_s4, %s7448_s3 }
0x10dc   : > { %p6473_p1 = pnand %p6472_p11, %p7556_p7 }
0x10dd   : > { %p6478_p12 = por %p6477_p9, %p6476_p6 }
0x10de   : > { %p6474_p5 = pneg %p6473_p1 }
0x10df   : > { %p6480_p13 = por %p6479_p3, %p6478_p12 }
0x10e1   : > { %p6481_p0 = pnand %p6480_p13, %p6474_p5 }
0x10e3   : > { %6484 = shalt.err (!%p6481_p0)
}
0x10e4   : > { %6099 = dma.vmem_to_hbm [thread:$0]  (%p7556_p7), %s7450_s10, 128, %s7448_s3, %s5006_s13  }
0x10e5 PF: > { %s5052_s17 = sand.u32 1, %s6523_s18   ;;  %p7560_p2 = scmp.ne.s32.totalorder %s7538_s14, 0 }
0x10e6   : > { %p7561_p8 = scmp.ge.s32.totalorder %s6535_s21, 2  ;;  %s5053_s22 = scalar_lea.sflag [#allocation4], %s5052_s17 }
0x10e8   : > { %p6121_p4 = pnand %p7561_p8, %p7560_p2 }
0x10ea   : > { %6514 = dma.done.wait (!%p6121_p4), %s5053_s22, 128  }
0x10eb   : > { %6516 = vsyncadd (!%p6121_p4), %s5053_s22, 4294967168  ;;  %s5062_s15 = scalar_lea.sflag [#allocation13], %s5052_s17 }
0x10ec   : > { %6518 = dma.done.wait (!%p6121_p4), %s5062_s15, 512  }
0x10ed   : > { %6520 = vsyncadd (!%p6121_p4), %s5062_s15, 4294966784  ;;  %p34_p7 = scmp.ge.s32.totalorder %s6783_s26, 4   ;;  %s7562_s18 = smov %s6527_s19 }
0x10ee   : > { %s7563_s19 = smov %s6531_s20  ;;  %s7564_s20 = smov %s6794_s11 }
0x10ef   : > { %s7565_s21 = smov %s6783_s26  ;;  %36 = sbr.rel (!%p34_p7) target bundleno = 19 (0x13), region = 175 }
0x10f6   :  { %5067 = vsyncpa [#allocation3], 1 }
0x10f7   :  { %5069 = vsyncpa [#allocation3 + $0x1], 1 }
0x10f8   :  { %5070 = vsyncpa [#allocation6], 1 }
0x10f9   :  { %5071 = vsyncpa [#allocation9], 1 }
0x10fa   :  { %5072 = vsyncpa [#allocation4], 1 }
0x10fb   :  { %5074 = vsyncpa [#allocation4 + $0x1], 1 }
0x10fc   :  { %5075 = vsyncpa [#allocation13], 1 }
0x10fd   :  { %5077 = vsyncpa [#allocation13 + $0x1], 1 }

</bundles_post_ra>
